<compile_context>
chip_gen: v5e
topology: v5e:2x2
jax: 0.10.0
libtpu: 0.0.40
codegen_flags: <defaults>
</compile_context>

<pallas_src>
import functools

import jax
import jax.numpy as jnp
from jax.experimental import pallas as pl
from jax.experimental.pallas import tpu as pltpu


# ----------------------------------------------------------------------------
# Pallas kernel: fused embedding + multi-layer LSTM recurrence + dense + ReLU
# ----------------------------------------------------------------------------
def _make_kernel(num_layers, T, Bp, Vp, H, OP):
    G = 4 * H
    TB = T * Bp

    def kernel(*refs):
        tok_ref = refs[0]                                # (T*Bp, 1) int32, time-major padded tokens
        layer_refs = refs[1:1 + 3 * num_layers]          # per layer: w_in, w_hh (bf16), b (f32)
                                                         #   layer 0 w_in = emb @ W_ih0^T  (Vp, 4H)
                                                         #   layer l>0 w_in = W_ih^T       (H, 4H)
        fc_w_ref = refs[1 + 3 * num_layers]              # (2H, OP) bf16
        fc_b_ref = refs[2 + 3 * num_layers]              # (1, OP)  f32
        out_ref = refs[3 + 3 * num_layers]               # (Bp, OP) f32
        seq_ref = refs[4 + 3 * num_layers]               # VMEM scratch (T*Bp, H) f32

        # --- fused embedding gather: one_hot(tokens) @ fused_table on the MXU ---
        tok = tok_ref[...]                                               # (TB, 1) int32
        vid = jax.lax.broadcasted_iota(jnp.int32, (TB, Vp), 1)
        one_hot = (vid == tok).astype(jnp.bfloat16)                      # (TB, Vp), lane-dense

        # Hoisted lane masks (gate layout i|f|g|o along the 4H=128 lanes).
        lane = jax.lax.broadcasted_iota(jnp.int32, (Bp, G), 1)
        is_g = (lane >= 2 * H) & (lane < 3 * H)
        pre = jnp.where(is_g, 2.0, 1.0).astype(jnp.float32)              # tanh(x) = 2*sigmoid(2x)-1

        h_first = None
        h = None
        for l in range(num_layers):
            w_in = layer_refs[3 * l][...]                                # bf16
            w_hh = layer_refs[3 * l + 1][...]                            # (H, 4H) bf16
            b = layer_refs[3 * l + 2][...]                               # (1, 4H) f32 (= b_ih + b_hh)

            # Hoisted input projection for the whole sequence, bias folded in.
            if l == 0:
                lhs = one_hot                                            # (TB, Vp)
            else:
                lhs = seq_ref[...].astype(jnp.bfloat16)                  # (TB, H), prev layer outputs
            gates_in = jnp.dot(lhs, w_in,
                               preferred_element_type=jnp.float32) + b   # (TB, 4H) f32

            h = jnp.zeros((Bp, H), jnp.float32)
            c = jnp.zeros((Bp, H), jnp.float32)
            for t in range(T):                                           # T small & static -> unrolled
                g = gates_in[t * Bp:(t + 1) * Bp, :] + jnp.dot(
                    h.astype(jnp.bfloat16), w_hh,
                    preferred_element_type=jnp.float32)                  # (Bp, 4H) f32, aligned slice

                # Single EUP pass: sigmoid everywhere, tanh on g-lanes via 2*sigmoid(2x)-1.
                s = jax.nn.sigmoid(g * pre)
                act = jnp.where(is_g, 2.0 * s - 1.0, s)

                i_g = act[:, 0:H]
                f_g = act[:, H:2 * H]
                g_g = act[:, 2 * H:3 * H]
                o_g = act[:, 3 * H:4 * H]
                c = f_g * c + i_g * g_g
                h = o_g * jnp.tanh(c)

                if l + 1 < num_layers:
                    seq_ref[t * Bp:(t + 1) * Bp, :] = h                  # aligned sublane-tile store

            if l == 0:
                h_first = h                                              # hidden[0, :, :]

        # hidden = cat(hidden[-1], hidden[0]); fc; relu  -> single fused MXU call.
        h_cat = jnp.concatenate([h, h_first], axis=1).astype(jnp.bfloat16)   # (Bp, 2H)
        dense = (jnp.dot(h_cat, fc_w_ref[...],
                         preferred_element_type=jnp.float32) + fc_b_ref[...])  # (Bp, OP)
        out_ref[...] = jnp.maximum(dense, 0.0)                           # unmasked (8,128) store

    return kernel


# ----------------------------------------------------------------------------
# One-time weight pre-pack (transpose, bf16 cast, bias fold, embedding fusion)
# ----------------------------------------------------------------------------
def prepack_params(params, *, num_layers, hidden_dim, output_dim):
    H = hidden_dim
    O = output_dim
    OP = max(128, ((O + 127) // 128) * 128)
    emb = params["embedding"].astype(jnp.float32)                        # (V, E)
    V = emb.shape[0]
    Vp = ((V + 127) // 128) * 128

    packed = []
    for l in range(num_layers):
        w_ih, w_hh, b_ih, b_hh = params["lstm"][l]
        if l == 0:
            # Fuse embedding table with layer-0 input projection: (V, E) @ (E, 4H) -> (V, 4H).
            w_in = emb @ jnp.transpose(w_ih).astype(jnp.float32)
            w_in = jnp.pad(w_in, ((0, Vp - V), (0, 0)))
        else:
            w_in = jnp.transpose(w_ih)
        packed.append(w_in.astype(jnp.bfloat16))                         # w_in
        packed.append(jnp.transpose(w_hh).astype(jnp.bfloat16))          # (H, 4H)
        packed.append((b_ih + b_hh).reshape(1, 4 * H).astype(jnp.float32))

    fc_w_t = jnp.transpose(params["fc_w"]).astype(jnp.float32)           # (2H, O); rows 0..H-1 -> h_last
    packed.append(jnp.pad(fc_w_t, ((0, 0), (0, OP - O))).astype(jnp.bfloat16))
    packed.append(jnp.pad(params["fc_b"].astype(jnp.float32), (0, OP - O)).reshape(1, OP))
    return tuple(packed)


# ----------------------------------------------------------------------------
# Jitted forward: tiny token pad/reshape + pallas_call + output slice
# ----------------------------------------------------------------------------
@functools.partial(jax.jit, static_argnames=("num_layers", "hidden_dim", "output_dim"))
def rnn_composition_forward(sample, packed, *, num_layers, hidden_dim, output_dim):
    B, T = sample.shape
    H = hidden_dim
    O = output_dim
    Bp = ((B + 7) // 8) * 8                                              # pad batch to a sublane tile
    Vp = packed[0].shape[0]
    OP = packed[-1].shape[1]

    # Time-major padded token ids -> (T*Bp, 1) int32 (only per-call glue left outside the kernel).
    tok = jnp.transpose(sample).astype(jnp.int32)                        # (T, B)
    tok = jnp.pad(tok, ((0, 0), (0, Bp - B)))                            # (T, Bp)
    tok = jnp.reshape(tok, (T * Bp, 1))

    inputs = (tok,) + tuple(packed)
    in_specs = [pl.BlockSpec(a.shape, lambda i: (0, 0)) for a in inputs]  # all 2-D, fully resident

    kernel = _make_kernel(num_layers, T, Bp, Vp, H, OP)
    out = pl.pallas_call(
        kernel,
        out_shape=jax.ShapeDtypeStruct((Bp, OP), jnp.float32),
        grid=(1,),
        in_specs=in_specs,
        out_specs=pl.BlockSpec((Bp, OP), lambda i: (0, 0)),
        scratch_shapes=[pltpu.VMEM((T * Bp, H), jnp.float32)],
        compiler_params=pltpu.CompilerParams(dimension_semantics=("arbitrary",)),
    )(*inputs)
    return out[:B, :O]


# ----------------------------------------------------------------------------
# Pure-JAX reference (mirrors PyTorch semantics, f32) for validation
# ----------------------------------------------------------------------------
def reference_forward(sample, params, *, num_layers, hidden_dim, output_dim):
    H = hidden_dim
    x = params["embedding"][sample].astype(jnp.float32)  # (B, T, E)
    B, T, _ = x.shape
    h_firsts = []
    layer_in = x
    h = None
    for l in range(num_layers):
        w_ih, w_hh, b_ih, b_hh = params["lstm"][l]
        h = jnp.zeros((B, H), jnp.float32)
        c = jnp.zeros((B, H), jnp.float32)
        outs = []
        for t in range(T):
            gates = layer_in[:, t, :] @ w_ih.T + b_ih + h @ w_hh.T + b_hh
            i_g = jax.nn.sigmoid(gates[:, 0:H])
            f_g = jax.nn.sigmoid(gates[:, H:2 * H])
            g_g = jnp.tanh(gates[:, 2 * H:3 * H])
            o_g = jax.nn.sigmoid(gates[:, 3 * H:4 * H])
            c = f_g * c + i_g * g_g
            h = o_g * jnp.tanh(c)
            outs.append(h)
        layer_in = jnp.stack(outs, axis=1)
        h_firsts.append(h)
    hidden = jnp.concatenate([h, h_firsts[0]], axis=1)   # cat(hidden[-1], hidden[0])
    dense = hidden @ params["fc_w"].T + params["fc_b"]
    return jnp.maximum(dense, 0.0)


# ----------------------------------------------------------------------------
# Deterministic parameter init (PyTorch-like uniform(-1/sqrt(H), 1/sqrt(H)))
# ----------------------------------------------------------------------------
def init_params(key, vocab_size, embed_dim, hidden_dim, num_layers, output_dim):
    keys = jax.random.split(key, 3 + 4 * num_layers)
    k = 1.0 / jnp.sqrt(hidden_dim)
    params = {
        "embedding": jax.random.normal(keys[0], (vocab_size, embed_dim), jnp.float32),
        "lstm": [],
        "fc_w": jax.random.uniform(keys[1], (output_dim, 2 * hidden_dim), jnp.float32, -k, k),
        "fc_b": jax.random.uniform(keys[2], (output_dim,), jnp.float32, -k, k),
    }
    for l in range(num_layers):
        in_dim = embed_dim if l == 0 else hidden_dim
        kw = keys[3 + 4 * l: 3 + 4 * (l + 1)]
        params["lstm"].append((
            jax.random.uniform(kw[0], (4 * hidden_dim, in_dim), jnp.float32, -k, k),      # w_ih
            jax.random.uniform(kw[1], (4 * hidden_dim, hidden_dim), jnp.float32, -k, k),  # w_hh
            jax.random.uniform(kw[2], (4 * hidden_dim,), jnp.float32, -k, k),             # b_ih
            jax.random.uniform(kw[3], (4 * hidden_dim,), jnp.float32, -k, k),             # b_hh
        ))
    return params


if __name__ == "__main__":
    # Small, module-consistent shapes.
    BATCH, SEQ = 2, 8
    VOCAB, EMBED, HIDDEN, LAYERS, OUT = 50, 32, 32, 2, 8

    key = jax.random.PRNGKey(0)
    k_tok, k_par = jax.random.split(key)
    sample = jax.random.randint(k_tok, (BATCH, SEQ), 0, VOCAB, dtype=jnp.int32)
    params = init_params(k_par, VOCAB, EMBED, HIDDEN, LAYERS, OUT)

    # One-time weight layout/fusion; per-call path only pads tokens and runs the kernel.
    packed = prepack_params(params, num_layers=LAYERS, hidden_dim=HIDDEN, output_dim=OUT)

    out = rnn_composition_forward(sample, packed, num_layers=LAYERS,
                                  hidden_dim=HIDDEN, output_dim=OUT)
    out = jax.block_until_ready(out)

    ref = reference_forward(sample, params, num_layers=LAYERS,
                            hidden_dim=HIDDEN, output_dim=OUT)
    assert out.shape == (BATCH, OUT)
    # Matmul operands are bf16 (f32 accumulation) in the kernel -> looser tolerance vs f32 ref.
    assert jnp.allclose(out, ref, rtol=5e-2, atol=5e-2), (out, ref)

    print("KERNEL_OK")
</pallas_src>

<mosaic_0001>
module attributes {stable_mosaic.version = 11 : i64} {
  func.func @kernel(%arg0: i32, %arg1: memref<64x1xi32, #tpu.memory_space<vmem>>, %arg2: memref<128x128xbf16, #tpu.memory_space<vmem>>, %arg3: memref<32x128xbf16, #tpu.memory_space<vmem>>, %arg4: memref<1x128xf32, #tpu.memory_space<vmem>>, %arg5: memref<32x128xbf16, #tpu.memory_space<vmem>>, %arg6: memref<32x128xbf16, #tpu.memory_space<vmem>>, %arg7: memref<1x128xf32, #tpu.memory_space<vmem>>, %arg8: memref<64x128xbf16, #tpu.memory_space<vmem>>, %arg9: memref<1x128xf32, #tpu.memory_space<vmem>>, %arg10: memref<8x128xf32, #tpu.memory_space<vmem>>, %arg11: memref<64x32xf32, #tpu.memory_space<vmem>>) attributes {dimension_semantics = [#tpu.dimension_semantics<arbitrary>], iteration_bounds = array<i64: 1>, scalar_prefetch = 0 : i64, scratch_operands = 1 : i64, tpu.core_type = #tpu.core_type<tc>, window_params = [{pipeline_mode = #tpu.pipeline_mode<synchronous>, transform_indices = @transform_0, window_bounds = array<i64: 64, 1>}, {pipeline_mode = #tpu.pipeline_mode<synchronous>, transform_indices = @transform_1, window_bounds = array<i64: 128, 128>}, {pipeline_mode = #tpu.pipeline_mode<synchronous>, transform_indices = @transform_2, window_bounds = array<i64: 32, 128>}, {pipeline_mode = #tpu.pipeline_mode<synchronous>, transform_indices = @transform_3, window_bounds = array<i64: 1, 128>}, {pipeline_mode = #tpu.pipeline_mode<synchronous>, transform_indices = @transform_4, window_bounds = array<i64: 32, 128>}, {pipeline_mode = #tpu.pipeline_mode<synchronous>, transform_indices = @transform_5, window_bounds = array<i64: 32, 128>}, {pipeline_mode = #tpu.pipeline_mode<synchronous>, transform_indices = @transform_6, window_bounds = array<i64: 1, 128>}, {pipeline_mode = #tpu.pipeline_mode<synchronous>, transform_indices = @transform_7, window_bounds = array<i64: 64, 128>}, {pipeline_mode = #tpu.pipeline_mode<synchronous>, transform_indices = @transform_8, window_bounds = array<i64: 1, 128>}, {pipeline_mode = #tpu.pipeline_mode<synchronous>, transform_indices = @transform_9, window_bounds = array<i64: 8, 128>}]} {
    %c0 = arith.constant 0 : index
    %c0_0 = arith.constant 0 : index
    %0 = vector.load %arg1[%c0, %c0_0] : memref<64x1xi32, #tpu.memory_space<vmem>>, vector<64x1xi32>
    %1 = tpu.iota {dimensions = array<i32: 1>} : vector<64x128xi32>
    %2 = vector.broadcast %0 : vector<64x1xi32> to vector<64x128xi32>
    %3 = arith.cmpi eq, %1, %2 : vector<64x128xi32>
    %4 = arith.extui %3 : vector<64x128xi1> to vector<64x128xi32>
    %5 = arith.sitofp %4 : vector<64x128xi32> to vector<64x128xf32>
    %6 = arith.truncf %5 : vector<64x128xf32> to vector<64x128xbf16>
    %7 = tpu.iota {dimensions = array<i32: 1>} : vector<8x128xi32>
    %c64_i32 = arith.constant 64 : i32
    %8 = vector.broadcast %c64_i32 : i32 to vector<8x128xi32>
    %9 = arith.cmpi sge, %7, %8 : vector<8x128xi32>
    %c96_i32 = arith.constant 96 : i32
    %10 = vector.broadcast %c96_i32 : i32 to vector<8x128xi32>
    %11 = arith.cmpi slt, %7, %10 : vector<8x128xi32>
    %12 = arith.andi %9, %11 : vector<8x128xi1>
    %cst = arith.constant 2.000000e+00 : f32
    %cst_1 = arith.constant 1.000000e+00 : f32
    %13 = vector.broadcast %cst : f32 to vector<8x128xf32>
    %14 = vector.broadcast %cst_1 : f32 to vector<8x128xf32>
    %15 = arith.select %12, %13, %14 : vector<8x128xi1>, vector<8x128xf32>
    %c0_2 = arith.constant 0 : index
    %c0_3 = arith.constant 0 : index
    %16 = vector.load %arg2[%c0_2, %c0_3] : memref<128x128xbf16, #tpu.memory_space<vmem>>, vector<128x128xbf16>
    %c0_4 = arith.constant 0 : index
    %c0_5 = arith.constant 0 : index
    %17 = vector.load %arg3[%c0_4, %c0_5] : memref<32x128xbf16, #tpu.memory_space<vmem>>, vector<32x128xbf16>
    %c0_6 = arith.constant 0 : index
    %c0_7 = arith.constant 0 : index
    %18 = vector.load %arg4[%c0_6, %c0_7] : memref<1x128xf32, #tpu.memory_space<vmem>>, vector<1x128xf32>
    %cst_8 = arith.constant dense<0.000000e+00> : vector<64x128xf32>
    %19 = tpu.matmul %6, %16, %cst_8 {dimension_numbers = #tpu.dot_dimension_numbers<[1], [0], [0], [1], [0, 0, 1, 1], [], []>} : vector<64x128xbf16>, vector<128x128xbf16>, vector<64x128xf32> -> vector<64x128xf32>
    %20 = vector.broadcast %18 : vector<1x128xf32> to vector<64x128xf32>
    %21 = arith.addf %19, %20 : vector<64x128xf32>
    %cst_9 = arith.constant 0.000000e+00 : f32
    %22 = vector.broadcast %cst_9 : f32 to vector<8x32xf32>
    %cst_10 = arith.constant 0.000000e+00 : f32
    %23 = vector.broadcast %cst_10 : f32 to vector<8x32xf32>
    %24 = vector.extract_strided_slice %21 {offsets = [0, 0], sizes = [8, 128], strides = [1, 1]} : vector<64x128xf32> to vector<8x128xf32>
    %25 = arith.truncf %22 : vector<8x32xf32> to vector<8x32xbf16>
    %cst_11 = arith.constant dense<0.000000e+00> : vector<8x128xf32>
    %26 = tpu.matmul %25, %17, %cst_11 {dimension_numbers = #tpu.dot_dimension_numbers<[1], [0], [0], [1], [0, 0, 1, 1], [], []>} : vector<8x32xbf16>, vector<32x128xbf16>, vector<8x128xf32> -> vector<8x128xf32>
    %27 = arith.addf %24, %26 : vector<8x128xf32>
    %28 = arith.mulf %27, %15 : vector<8x128xf32>
    %29 = arith.negf %28 : vector<8x128xf32>
    %30 = math.exp %29 : vector<8x128xf32>
    %cst_12 = arith.constant 1.000000e+00 : f32
    %31 = vector.broadcast %cst_12 : f32 to vector<8x128xf32>
    %32 = arith.addf %31, %30 : vector<8x128xf32>
    %33 = arith.divf %31, %32 : vector<8x128xf32>
    %cst_13 = arith.constant 2.000000e+00 : f32
    %34 = vector.broadcast %cst_13 : f32 to vector<8x128xf32>
    %35 = arith.mulf %34, %33 : vector<8x128xf32>
    %cst_14 = arith.constant 1.000000e+00 : f32
    %36 = vector.broadcast %cst_14 : f32 to vector<8x128xf32>
    %37 = arith.subf %35, %36 : vector<8x128xf32>
    %38 = arith.select %12, %37, %33 : vector<8x128xi1>, vector<8x128xf32>
    %39 = vector.extract_strided_slice %38 {offsets = [0, 0], sizes = [8, 32], strides = [1, 1]} : vector<8x128xf32> to vector<8x32xf32>
    %40 = vector.extract_strided_slice %38 {offsets = [0, 32], sizes = [8, 32], strides = [1, 1]} : vector<8x128xf32> to vector<8x32xf32>
    %41 = vector.extract_strided_slice %38 {offsets = [0, 64], sizes = [8, 32], strides = [1, 1]} : vector<8x128xf32> to vector<8x32xf32>
    %42 = vector.extract_strided_slice %38 {offsets = [0, 96], sizes = [8, 32], strides = [1, 1]} : vector<8x128xf32> to vector<8x32xf32>
    %43 = arith.mulf %40, %23 : vector<8x32xf32>
    %44 = arith.mulf %39, %41 : vector<8x32xf32>
    %45 = arith.addf %43, %44 : vector<8x32xf32>
    %46 = math.tanh %45 : vector<8x32xf32>
    %47 = arith.mulf %42, %46 : vector<8x32xf32>
    %c0_15 = arith.constant 0 : index
    %c0_16 = arith.constant 0 : index
    %48 = vector.load %arg11[%c0_15, %c0_16] : memref<64x32xf32, #tpu.memory_space<vmem>>, vector<8x32xf32>
    tpu.vector_store %arg11[%c0_15, %c0_16], %47 {strides = array<i32>} : memref<64x32xf32, #tpu.memory_space<vmem>>, vector<8x32xf32>,
    %49 = vector.extract_strided_slice %21 {offsets = [8, 0], sizes = [8, 128], strides = [1, 1]} : vector<64x128xf32> to vector<8x128xf32>
    %50 = arith.truncf %47 : vector<8x32xf32> to vector<8x32xbf16>
    %cst_17 = arith.constant dense<0.000000e+00> : vector<8x128xf32>
    %51 = tpu.matmul %50, %17, %cst_17 {dimension_numbers = #tpu.dot_dimension_numbers<[1], [0], [0], [1], [0, 0, 1, 1], [], []>} : vector<8x32xbf16>, vector<32x128xbf16>, vector<8x128xf32> -> vector<8x128xf32>
    %52 = arith.addf %49, %51 : vector<8x128xf32>
    %53 = arith.mulf %52, %15 : vector<8x128xf32>
    %54 = arith.negf %53 : vector<8x128xf32>
    %55 = math.exp %54 : vector<8x128xf32>
    %cst_18 = arith.constant 1.000000e+00 : f32
    %56 = vector.broadcast %cst_18 : f32 to vector<8x128xf32>
    %57 = arith.addf %56, %55 : vector<8x128xf32>
    %58 = arith.divf %56, %57 : vector<8x128xf32>
    %cst_19 = arith.constant 2.000000e+00 : f32
    %59 = vector.broadcast %cst_19 : f32 to vector<8x128xf32>
    %60 = arith.mulf %59, %58 : vector<8x128xf32>
    %cst_20 = arith.constant 1.000000e+00 : f32
    %61 = vector.broadcast %cst_20 : f32 to vector<8x128xf32>
    %62 = arith.subf %60, %61 : vector<8x128xf32>
    %63 = arith.select %12, %62, %58 : vector<8x128xi1>, vector<8x128xf32>
    %64 = vector.extract_strided_slice %63 {offsets = [0, 0], sizes = [8, 32], strides = [1, 1]} : vector<8x128xf32> to vector<8x32xf32>
    %65 = vector.extract_strided_slice %63 {offsets = [0, 32], sizes = [8, 32], strides = [1, 1]} : vector<8x128xf32> to vector<8x32xf32>
    %66 = vector.extract_strided_slice %63 {offsets = [0, 64], sizes = [8, 32], strides = [1, 1]} : vector<8x128xf32> to vector<8x32xf32>
    %67 = vector.extract_strided_slice %63 {offsets = [0, 96], sizes = [8, 32], strides = [1, 1]} : vector<8x128xf32> to vector<8x32xf32>
    %68 = arith.mulf %65, %45 : vector<8x32xf32>
    %69 = arith.mulf %64, %66 : vector<8x32xf32>
    %70 = arith.addf %68, %69 : vector<8x32xf32>
    %71 = math.tanh %70 : vector<8x32xf32>
    %72 = arith.mulf %67, %71 : vector<8x32xf32>
    %c8 = arith.constant 8 : index
    %c0_21 = arith.constant 0 : index
    %73 = vector.load %arg11[%c8, %c0_21] : memref<64x32xf32, #tpu.memory_space<vmem>>, vector<8x32xf32>
    tpu.vector_store %arg11[%c8, %c0_21], %72 {strides = array<i32>} : memref<64x32xf32, #tpu.memory_space<vmem>>, vector<8x32xf32>,
    %74 = vector.extract_strided_slice %21 {offsets = [16, 0], sizes = [8, 128], strides = [1, 1]} : vector<64x128xf32> to vector<8x128xf32>
    %75 = arith.truncf %72 : vector<8x32xf32> to vector<8x32xbf16>
    %cst_22 = arith.constant dense<0.000000e+00> : vector<8x128xf32>
    %76 = tpu.matmul %75, %17, %cst_22 {dimension_numbers = #tpu.dot_dimension_numbers<[1], [0], [0], [1], [0, 0, 1, 1], [], []>} : vector<8x32xbf16>, vector<32x128xbf16>, vector<8x128xf32> -> vector<8x128xf32>
    %77 = arith.addf %74, %76 : vector<8x128xf32>
    %78 = arith.mulf %77, %15 : vector<8x128xf32>
    %79 = arith.negf %78 : vector<8x128xf32>
    %80 = math.exp %79 : vector<8x128xf32>
    %cst_23 = arith.constant 1.000000e+00 : f32
    %81 = vector.broadcast %cst_23 : f32 to vector<8x128xf32>
    %82 = arith.addf %81, %80 : vector<8x128xf32>
    %83 = arith.divf %81, %82 : vector<8x128xf32>
    %cst_24 = arith.constant 2.000000e+00 : f32
    %84 = vector.broadcast %cst_24 : f32 to vector<8x128xf32>
    %85 = arith.mulf %84, %83 : vector<8x128xf32>
    %cst_25 = arith.constant 1.000000e+00 : f32
    %86 = vector.broadcast %cst_25 : f32 to vector<8x128xf32>
    %87 = arith.subf %85, %86 : vector<8x128xf32>
    %88 = arith.select %12, %87, %83 : vector<8x128xi1>, vector<8x128xf32>
    %89 = vector.extract_strided_slice %88 {offsets = [0, 0], sizes = [8, 32], strides = [1, 1]} : vector<8x128xf32> to vector<8x32xf32>
    %90 = vector.extract_strided_slice %88 {offsets = [0, 32], sizes = [8, 32], strides = [1, 1]} : vector<8x128xf32> to vector<8x32xf32>
    %91 = vector.extract_strided_slice %88 {offsets = [0, 64], sizes = [8, 32], strides = [1, 1]} : vector<8x128xf32> to vector<8x32xf32>
    %92 = vector.extract_strided_slice %88 {offsets = [0, 96], sizes = [8, 32], strides = [1, 1]} : vector<8x128xf32> to vector<8x32xf32>
    %93 = arith.mulf %90, %70 : vector<8x32xf32>
    %94 = arith.mulf %89, %91 : vector<8x32xf32>
    %95 = arith.addf %93, %94 : vector<8x32xf32>
    %96 = math.tanh %95 : vector<8x32xf32>
    %97 = arith.mulf %92, %96 : vector<8x32xf32>
    %c16 = arith.constant 16 : index
    %c0_26 = arith.constant 0 : index
    %98 = vector.load %arg11[%c16, %c0_26] : memref<64x32xf32, #tpu.memory_space<vmem>>, vector<8x32xf32>
    tpu.vector_store %arg11[%c16, %c0_26], %97 {strides = array<i32>} : memref<64x32xf32, #tpu.memory_space<vmem>>, vector<8x32xf32>,
    %99 = vector.extract_strided_slice %21 {offsets = [24, 0], sizes = [8, 128], strides = [1, 1]} : vector<64x128xf32> to vector<8x128xf32>
    %100 = arith.truncf %97 : vector<8x32xf32> to vector<8x32xbf16>
    %cst_27 = arith.constant dense<0.000000e+00> : vector<8x128xf32>
    %101 = tpu.matmul %100, %17, %cst_27 {dimension_numbers = #tpu.dot_dimension_numbers<[1], [0], [0], [1], [0, 0, 1, 1], [], []>} : vector<8x32xbf16>, vector<32x128xbf16>, vector<8x128xf32> -> vector<8x128xf32>
    %102 = arith.addf %99, %101 : vector<8x128xf32>
    %103 = arith.mulf %102, %15 : vector<8x128xf32>
    %104 = arith.negf %103 : vector<8x128xf32>
    %105 = math.exp %104 : vector<8x128xf32>
    %cst_28 = arith.constant 1.000000e+00 : f32
    %106 = vector.broadcast %cst_28 : f32 to vector<8x128xf32>
    %107 = arith.addf %106, %105 : vector<8x128xf32>
    %108 = arith.divf %106, %107 : vector<8x128xf32>
    %cst_29 = arith.constant 2.000000e+00 : f32
    %109 = vector.broadcast %cst_29 : f32 to vector<8x128xf32>
    %110 = arith.mulf %109, %108 : vector<8x128xf32>
    %cst_30 = arith.constant 1.000000e+00 : f32
    %111 = vector.broadcast %cst_30 : f32 to vector<8x128xf32>
    %112 = arith.subf %110, %111 : vector<8x128xf32>
    %113 = arith.select %12, %112, %108 : vector<8x128xi1>, vector<8x128xf32>
    %114 = vector.extract_strided_slice %113 {offsets = [0, 0], sizes = [8, 32], strides = [1, 1]} : vector<8x128xf32> to vector<8x32xf32>
    %115 = vector.extract_strided_slice %113 {offsets = [0, 32], sizes = [8, 32], strides = [1, 1]} : vector<8x128xf32> to vector<8x32xf32>
    %116 = vector.extract_strided_slice %113 {offsets = [0, 64], sizes = [8, 32], strides = [1, 1]} : vector<8x128xf32> to vector<8x32xf32>
    %117 = vector.extract_strided_slice %113 {offsets = [0, 96], sizes = [8, 32], strides = [1, 1]} : vector<8x128xf32> to vector<8x32xf32>
    %118 = arith.mulf %115, %95 : vector<8x32xf32>
    %119 = arith.mulf %114, %116 : vector<8x32xf32>
    %120 = arith.addf %118, %119 : vector<8x32xf32>
    %121 = math.tanh %120 : vector<8x32xf32>
    %122 = arith.mulf %117, %121 : vector<8x32xf32>
    %c24 = arith.constant 24 : index
    %c0_31 = arith.constant 0 : index
    %123 = vector.load %arg11[%c24, %c0_31] : memref<64x32xf32, #tpu.memory_space<vmem>>, vector<8x32xf32>
    tpu.vector_store %arg11[%c24, %c0_31], %122 {strides = array<i32>} : memref<64x32xf32, #tpu.memory_space<vmem>>, vector<8x32xf32>,
    %124 = vector.extract_strided_slice %21 {offsets = [32, 0], sizes = [8, 128], strides = [1, 1]} : vector<64x128xf32> to vector<8x128xf32>
    %125 = arith.truncf %122 : vector<8x32xf32> to vector<8x32xbf16>
    %cst_32 = arith.constant dense<0.000000e+00> : vector<8x128xf32>
    %126 = tpu.matmul %125, %17, %cst_32 {dimension_numbers = #tpu.dot_dimension_numbers<[1], [0], [0], [1], [0, 0, 1, 1], [], []>} : vector<8x32xbf16>, vector<32x128xbf16>, vector<8x128xf32> -> vector<8x128xf32>
    %127 = arith.addf %124, %126 : vector<8x128xf32>
    %128 = arith.mulf %127, %15 : vector<8x128xf32>
    %129 = arith.negf %128 : vector<8x128xf32>
    %130 = math.exp %129 : vector<8x128xf32>
    %cst_33 = arith.constant 1.000000e+00 : f32
    %131 = vector.broadcast %cst_33 : f32 to vector<8x128xf32>
    %132 = arith.addf %131, %130 : vector<8x128xf32>
    %133 = arith.divf %131, %132 : vector<8x128xf32>
    %cst_34 = arith.constant 2.000000e+00 : f32
    %134 = vector.broadcast %cst_34 : f32 to vector<8x128xf32>
    %135 = arith.mulf %134, %133 : vector<8x128xf32>
    %cst_35 = arith.constant 1.000000e+00 : f32
    %136 = vector.broadcast %cst_35 : f32 to vector<8x128xf32>
    %137 = arith.subf %135, %136 : vector<8x128xf32>
    %138 = arith.select %12, %137, %133 : vector<8x128xi1>, vector<8x128xf32>
    %139 = vector.extract_strided_slice %138 {offsets = [0, 0], sizes = [8, 32], strides = [1, 1]} : vector<8x128xf32> to vector<8x32xf32>
    %140 = vector.extract_strided_slice %138 {offsets = [0, 32], sizes = [8, 32], strides = [1, 1]} : vector<8x128xf32> to vector<8x32xf32>
    %141 = vector.extract_strided_slice %138 {offsets = [0, 64], sizes = [8, 32], strides = [1, 1]} : vector<8x128xf32> to vector<8x32xf32>
    %142 = vector.extract_strided_slice %138 {offsets = [0, 96], sizes = [8, 32], strides = [1, 1]} : vector<8x128xf32> to vector<8x32xf32>
    %143 = arith.mulf %140, %120 : vector<8x32xf32>
    %144 = arith.mulf %139, %141 : vector<8x32xf32>
    %145 = arith.addf %143, %144 : vector<8x32xf32>
    %146 = math.tanh %145 : vector<8x32xf32>
    %147 = arith.mulf %142, %146 : vector<8x32xf32>
    %c32 = arith.constant 32 : index
    %c0_36 = arith.constant 0 : index
    %148 = vector.load %arg11[%c32, %c0_36] : memref<64x32xf32, #tpu.memory_space<vmem>>, vector<8x32xf32>
    tpu.vector_store %arg11[%c32, %c0_36], %147 {strides = array<i32>} : memref<64x32xf32, #tpu.memory_space<vmem>>, vector<8x32xf32>,
    %149 = vector.extract_strided_slice %21 {offsets = [40, 0], sizes = [8, 128], strides = [1, 1]} : vector<64x128xf32> to vector<8x128xf32>
    %150 = arith.truncf %147 : vector<8x32xf32> to vector<8x32xbf16>
    %cst_37 = arith.constant dense<0.000000e+00> : vector<8x128xf32>
    %151 = tpu.matmul %150, %17, %cst_37 {dimension_numbers = #tpu.dot_dimension_numbers<[1], [0], [0], [1], [0, 0, 1, 1], [], []>} : vector<8x32xbf16>, vector<32x128xbf16>, vector<8x128xf32> -> vector<8x128xf32>
    %152 = arith.addf %149, %151 : vector<8x128xf32>
    %153 = arith.mulf %152, %15 : vector<8x128xf32>
    %154 = arith.negf %153 : vector<8x128xf32>
    %155 = math.exp %154 : vector<8x128xf32>
    %cst_38 = arith.constant 1.000000e+00 : f32
    %156 = vector.broadcast %cst_38 : f32 to vector<8x128xf32>
    %157 = arith.addf %156, %155 : vector<8x128xf32>
    %158 = arith.divf %156, %157 : vector<8x128xf32>
    %cst_39 = arith.constant 2.000000e+00 : f32
    %159 = vector.broadcast %cst_39 : f32 to vector<8x128xf32>
    %160 = arith.mulf %159, %158 : vector<8x128xf32>
    %cst_40 = arith.constant 1.000000e+00 : f32
    %161 = vector.broadcast %cst_40 : f32 to vector<8x128xf32>
    %162 = arith.subf %160, %161 : vector<8x128xf32>
    %163 = arith.select %12, %162, %158 : vector<8x128xi1>, vector<8x128xf32>
    %164 = vector.extract_strided_slice %163 {offsets = [0, 0], sizes = [8, 32], strides = [1, 1]} : vector<8x128xf32> to vector<8x32xf32>
    %165 = vector.extract_strided_slice %163 {offsets = [0, 32], sizes = [8, 32], strides = [1, 1]} : vector<8x128xf32> to vector<8x32xf32>
    %166 = vector.extract_strided_slice %163 {offsets = [0, 64], sizes = [8, 32], strides = [1, 1]} : vector<8x128xf32> to vector<8x32xf32>
    %167 = vector.extract_strided_slice %163 {offsets = [0, 96], sizes = [8, 32], strides = [1, 1]} : vector<8x128xf32> to vector<8x32xf32>
    %168 = arith.mulf %165, %145 : vector<8x32xf32>
    %169 = arith.mulf %164, %166 : vector<8x32xf32>
    %170 = arith.addf %168, %169 : vector<8x32xf32>
    %171 = math.tanh %170 : vector<8x32xf32>
    %172 = arith.mulf %167, %171 : vector<8x32xf32>
    %c40 = arith.constant 40 : index
    %c0_41 = arith.constant 0 : index
    %173 = vector.load %arg11[%c40, %c0_41] : memref<64x32xf32, #tpu.memory_space<vmem>>, vector<8x32xf32>
    tpu.vector_store %arg11[%c40, %c0_41], %172 {strides = array<i32>} : memref<64x32xf32, #tpu.memory_space<vmem>>, vector<8x32xf32>,
    %174 = vector.extract_strided_slice %21 {offsets = [48, 0], sizes = [8, 128], strides = [1, 1]} : vector<64x128xf32> to vector<8x128xf32>
    %175 = arith.truncf %172 : vector<8x32xf32> to vector<8x32xbf16>
    %cst_42 = arith.constant dense<0.000000e+00> : vector<8x128xf32>
    %176 = tpu.matmul %175, %17, %cst_42 {dimension_numbers = #tpu.dot_dimension_numbers<[1], [0], [0], [1], [0, 0, 1, 1], [], []>} : vector<8x32xbf16>, vector<32x128xbf16>, vector<8x128xf32> -> vector<8x128xf32>
    %177 = arith.addf %174, %176 : vector<8x128xf32>
    %178 = arith.mulf %177, %15 : vector<8x128xf32>
    %179 = arith.negf %178 : vector<8x128xf32>
    %180 = math.exp %179 : vector<8x128xf32>
    %cst_43 = arith.constant 1.000000e+00 : f32
    %181 = vector.broadcast %cst_43 : f32 to vector<8x128xf32>
    %182 = arith.addf %181, %180 : vector<8x128xf32>
    %183 = arith.divf %181, %182 : vector<8x128xf32>
    %cst_44 = arith.constant 2.000000e+00 : f32
    %184 = vector.broadcast %cst_44 : f32 to vector<8x128xf32>
    %185 = arith.mulf %184, %183 : vector<8x128xf32>
    %cst_45 = arith.constant 1.000000e+00 : f32
    %186 = vector.broadcast %cst_45 : f32 to vector<8x128xf32>
    %187 = arith.subf %185, %186 : vector<8x128xf32>
    %188 = arith.select %12, %187, %183 : vector<8x128xi1>, vector<8x128xf32>
    %189 = vector.extract_strided_slice %188 {offsets = [0, 0], sizes = [8, 32], strides = [1, 1]} : vector<8x128xf32> to vector<8x32xf32>
    %190 = vector.extract_strided_slice %188 {offsets = [0, 32], sizes = [8, 32], strides = [1, 1]} : vector<8x128xf32> to vector<8x32xf32>
    %191 = vector.extract_strided_slice %188 {offsets = [0, 64], sizes = [8, 32], strides = [1, 1]} : vector<8x128xf32> to vector<8x32xf32>
    %192 = vector.extract_strided_slice %188 {offsets = [0, 96], sizes = [8, 32], strides = [1, 1]} : vector<8x128xf32> to vector<8x32xf32>
    %193 = arith.mulf %190, %170 : vector<8x32xf32>
    %194 = arith.mulf %189, %191 : vector<8x32xf32>
    %195 = arith.addf %193, %194 : vector<8x32xf32>
    %196 = math.tanh %195 : vector<8x32xf32>
    %197 = arith.mulf %192, %196 : vector<8x32xf32>
    %c48 = arith.constant 48 : index
    %c0_46 = arith.constant 0 : index
    %198 = vector.load %arg11[%c48, %c0_46] : memref<64x32xf32, #tpu.memory_space<vmem>>, vector<8x32xf32>
    tpu.vector_store %arg11[%c48, %c0_46], %197 {strides = array<i32>} : memref<64x32xf32, #tpu.memory_space<vmem>>, vector<8x32xf32>,
    %199 = vector.extract_strided_slice %21 {offsets = [56, 0], sizes = [8, 128], strides = [1, 1]} : vector<64x128xf32> to vector<8x128xf32>
    %200 = arith.truncf %197 : vector<8x32xf32> to vector<8x32xbf16>
    %cst_47 = arith.constant dense<0.000000e+00> : vector<8x128xf32>
    %201 = tpu.matmul %200, %17, %cst_47 {dimension_numbers = #tpu.dot_dimension_numbers<[1], [0], [0], [1], [0, 0, 1, 1], [], []>} : vector<8x32xbf16>, vector<32x128xbf16>, vector<8x128xf32> -> vector<8x128xf32>
    %202 = arith.addf %199, %201 : vector<8x128xf32>
    %203 = arith.mulf %202, %15 : vector<8x128xf32>
    %204 = arith.negf %203 : vector<8x128xf32>
    %205 = math.exp %204 : vector<8x128xf32>
    %cst_48 = arith.constant 1.000000e+00 : f32
    %206 = vector.broadcast %cst_48 : f32 to vector<8x128xf32>
    %207 = arith.addf %206, %205 : vector<8x128xf32>
    %208 = arith.divf %206, %207 : vector<8x128xf32>
    %cst_49 = arith.constant 2.000000e+00 : f32
    %209 = vector.broadcast %cst_49 : f32 to vector<8x128xf32>
    %210 = arith.mulf %209, %208 : vector<8x128xf32>
    %cst_50 = arith.constant 1.000000e+00 : f32
    %211 = vector.broadcast %cst_50 : f32 to vector<8x128xf32>
    %212 = arith.subf %210, %211 : vector<8x128xf32>
    %213 = arith.select %12, %212, %208 : vector<8x128xi1>, vector<8x128xf32>
    %214 = vector.extract_strided_slice %213 {offsets = [0, 0], sizes = [8, 32], strides = [1, 1]} : vector<8x128xf32> to vector<8x32xf32>
    %215 = vector.extract_strided_slice %213 {offsets = [0, 32], sizes = [8, 32], strides = [1, 1]} : vector<8x128xf32> to vector<8x32xf32>
    %216 = vector.extract_strided_slice %213 {offsets = [0, 64], sizes = [8, 32], strides = [1, 1]} : vector<8x128xf32> to vector<8x32xf32>
    %217 = vector.extract_strided_slice %213 {offsets = [0, 96], sizes = [8, 32], strides = [1, 1]} : vector<8x128xf32> to vector<8x32xf32>
    %218 = arith.mulf %215, %195 : vector<8x32xf32>
    %219 = arith.mulf %214, %216 : vector<8x32xf32>
    %220 = arith.addf %218, %219 : vector<8x32xf32>
    %221 = math.tanh %220 : vector<8x32xf32>
    %222 = arith.mulf %217, %221 : vector<8x32xf32>
    %c56 = arith.constant 56 : index
    %c0_51 = arith.constant 0 : index
    %223 = vector.load %arg11[%c56, %c0_51] : memref<64x32xf32, #tpu.memory_space<vmem>>, vector<8x32xf32>
    tpu.vector_store %arg11[%c56, %c0_51], %222 {strides = array<i32>} : memref<64x32xf32, #tpu.memory_space<vmem>>, vector<8x32xf32>,
    %c0_52 = arith.constant 0 : index
    %c0_53 = arith.constant 0 : index
    %224 = vector.load %arg5[%c0_52, %c0_53] : memref<32x128xbf16, #tpu.memory_space<vmem>>, vector<32x128xbf16>
    %c0_54 = arith.constant 0 : index
    %c0_55 = arith.constant 0 : index
    %225 = vector.load %arg6[%c0_54, %c0_55] : memref<32x128xbf16, #tpu.memory_space<vmem>>, vector<32x128xbf16>
    %c0_56 = arith.constant 0 : index
    %c0_57 = arith.constant 0 : index
    %226 = vector.load %arg7[%c0_56, %c0_57] : memref<1x128xf32, #tpu.memory_space<vmem>>, vector<1x128xf32>
    %c0_58 = arith.constant 0 : index
    %c0_59 = arith.constant 0 : index
    %227 = vector.load %arg11[%c0_58, %c0_59] : memref<64x32xf32, #tpu.memory_space<vmem>>, vector<64x32xf32>
    %228 = arith.truncf %227 : vector<64x32xf32> to vector<64x32xbf16>
    %cst_60 = arith.constant dense<0.000000e+00> : vector<64x128xf32>
    %229 = tpu.matmul %228, %224, %cst_60 {dimension_numbers = #tpu.dot_dimension_numbers<[1], [0], [0], [1], [0, 0, 1, 1], [], []>} : vector<64x32xbf16>, vector<32x128xbf16>, vector<64x128xf32> -> vector<64x128xf32>
    %230 = vector.broadcast %226 : vector<1x128xf32> to vector<64x128xf32>
    %231 = arith.addf %229, %230 : vector<64x128xf32>
    %cst_61 = arith.constant 0.000000e+00 : f32
    %232 = vector.broadcast %cst_61 : f32 to vector<8x32xf32>
    %cst_62 = arith.constant 0.000000e+00 : f32
    %233 = vector.broadcast %cst_62 : f32 to vector<8x32xf32>
    %234 = vector.extract_strided_slice %231 {offsets = [0, 0], sizes = [8, 128], strides = [1, 1]} : vector<64x128xf32> to vector<8x128xf32>
    %235 = arith.truncf %232 : vector<8x32xf32> to vector<8x32xbf16>
    %cst_63 = arith.constant dense<0.000000e+00> : vector<8x128xf32>
    %236 = tpu.matmul %235, %225, %cst_63 {dimension_numbers = #tpu.dot_dimension_numbers<[1], [0], [0], [1], [0, 0, 1, 1], [], []>} : vector<8x32xbf16>, vector<32x128xbf16>, vector<8x128xf32> -> vector<8x128xf32>
    %237 = arith.addf %234, %236 : vector<8x128xf32>
    %238 = arith.mulf %237, %15 : vector<8x128xf32>
    %239 = arith.negf %238 : vector<8x128xf32>
    %240 = math.exp %239 : vector<8x128xf32>
    %cst_64 = arith.constant 1.000000e+00 : f32
    %241 = vector.broadcast %cst_64 : f32 to vector<8x128xf32>
    %242 = arith.addf %241, %240 : vector<8x128xf32>
    %243 = arith.divf %241, %242 : vector<8x128xf32>
    %cst_65 = arith.constant 2.000000e+00 : f32
    %244 = vector.broadcast %cst_65 : f32 to vector<8x128xf32>
    %245 = arith.mulf %244, %243 : vector<8x128xf32>
    %cst_66 = arith.constant 1.000000e+00 : f32
    %246 = vector.broadcast %cst_66 : f32 to vector<8x128xf32>
    %247 = arith.subf %245, %246 : vector<8x128xf32>
    %248 = arith.select %12, %247, %243 : vector<8x128xi1>, vector<8x128xf32>
    %249 = vector.extract_strided_slice %248 {offsets = [0, 0], sizes = [8, 32], strides = [1, 1]} : vector<8x128xf32> to vector<8x32xf32>
    %250 = vector.extract_strided_slice %248 {offsets = [0, 32], sizes = [8, 32], strides = [1, 1]} : vector<8x128xf32> to vector<8x32xf32>
    %251 = vector.extract_strided_slice %248 {offsets = [0, 64], sizes = [8, 32], strides = [1, 1]} : vector<8x128xf32> to vector<8x32xf32>
    %252 = vector.extract_strided_slice %248 {offsets = [0, 96], sizes = [8, 32], strides = [1, 1]} : vector<8x128xf32> to vector<8x32xf32>
    %253 = arith.mulf %250, %233 : vector<8x32xf32>
    %254 = arith.mulf %249, %251 : vector<8x32xf32>
    %255 = arith.addf %253, %254 : vector<8x32xf32>
    %256 = math.tanh %255 : vector<8x32xf32>
    %257 = arith.mulf %252, %256 : vector<8x32xf32>
    %258 = vector.extract_strided_slice %231 {offsets = [8, 0], sizes = [8, 128], strides = [1, 1]} : vector<64x128xf32> to vector<8x128xf32>
    %259 = arith.truncf %257 : vector<8x32xf32> to vector<8x32xbf16>
    %cst_67 = arith.constant dense<0.000000e+00> : vector<8x128xf32>
    %260 = tpu.matmul %259, %225, %cst_67 {dimension_numbers = #tpu.dot_dimension_numbers<[1], [0], [0], [1], [0, 0, 1, 1], [], []>} : vector<8x32xbf16>, vector<32x128xbf16>, vector<8x128xf32> -> vector<8x128xf32>
    %261 = arith.addf %258, %260 : vector<8x128xf32>
    %262 = arith.mulf %261, %15 : vector<8x128xf32>
    %263 = arith.negf %262 : vector<8x128xf32>
    %264 = math.exp %263 : vector<8x128xf32>
    %cst_68 = arith.constant 1.000000e+00 : f32
    %265 = vector.broadcast %cst_68 : f32 to vector<8x128xf32>
    %266 = arith.addf %265, %264 : vector<8x128xf32>
    %267 = arith.divf %265, %266 : vector<8x128xf32>
    %cst_69 = arith.constant 2.000000e+00 : f32
    %268 = vector.broadcast %cst_69 : f32 to vector<8x128xf32>
    %269 = arith.mulf %268, %267 : vector<8x128xf32>
    %cst_70 = arith.constant 1.000000e+00 : f32
    %270 = vector.broadcast %cst_70 : f32 to vector<8x128xf32>
    %271 = arith.subf %269, %270 : vector<8x128xf32>
    %272 = arith.select %12, %271, %267 : vector<8x128xi1>, vector<8x128xf32>
    %273 = vector.extract_strided_slice %272 {offsets = [0, 0], sizes = [8, 32], strides = [1, 1]} : vector<8x128xf32> to vector<8x32xf32>
    %274 = vector.extract_strided_slice %272 {offsets = [0, 32], sizes = [8, 32], strides = [1, 1]} : vector<8x128xf32> to vector<8x32xf32>
    %275 = vector.extract_strided_slice %272 {offsets = [0, 64], sizes = [8, 32], strides = [1, 1]} : vector<8x128xf32> to vector<8x32xf32>
    %276 = vector.extract_strided_slice %272 {offsets = [0, 96], sizes = [8, 32], strides = [1, 1]} : vector<8x128xf32> to vector<8x32xf32>
    %277 = arith.mulf %274, %255 : vector<8x32xf32>
    %278 = arith.mulf %273, %275 : vector<8x32xf32>
    %279 = arith.addf %277, %278 : vector<8x32xf32>
    %280 = math.tanh %279 : vector<8x32xf32>
    %281 = arith.mulf %276, %280 : vector<8x32xf32>
    %282 = vector.extract_strided_slice %231 {offsets = [16, 0], sizes = [8, 128], strides = [1, 1]} : vector<64x128xf32> to vector<8x128xf32>
    %283 = arith.truncf %281 : vector<8x32xf32> to vector<8x32xbf16>
    %cst_71 = arith.constant dense<0.000000e+00> : vector<8x128xf32>
    %284 = tpu.matmul %283, %225, %cst_71 {dimension_numbers = #tpu.dot_dimension_numbers<[1], [0], [0], [1], [0, 0, 1, 1], [], []>} : vector<8x32xbf16>, vector<32x128xbf16>, vector<8x128xf32> -> vector<8x128xf32>
    %285 = arith.addf %282, %284 : vector<8x128xf32>
    %286 = arith.mulf %285, %15 : vector<8x128xf32>
    %287 = arith.negf %286 : vector<8x128xf32>
    %288 = math.exp %287 : vector<8x128xf32>
    %cst_72 = arith.constant 1.000000e+00 : f32
    %289 = vector.broadcast %cst_72 : f32 to vector<8x128xf32>
    %290 = arith.addf %289, %288 : vector<8x128xf32>
    %291 = arith.divf %289, %290 : vector<8x128xf32>
    %cst_73 = arith.constant 2.000000e+00 : f32
    %292 = vector.broadcast %cst_73 : f32 to vector<8x128xf32>
    %293 = arith.mulf %292, %291 : vector<8x128xf32>
    %cst_74 = arith.constant 1.000000e+00 : f32
    %294 = vector.broadcast %cst_74 : f32 to vector<8x128xf32>
    %295 = arith.subf %293, %294 : vector<8x128xf32>
    %296 = arith.select %12, %295, %291 : vector<8x128xi1>, vector<8x128xf32>
    %297 = vector.extract_strided_slice %296 {offsets = [0, 0], sizes = [8, 32], strides = [1, 1]} : vector<8x128xf32> to vector<8x32xf32>
    %298 = vector.extract_strided_slice %296 {offsets = [0, 32], sizes = [8, 32], strides = [1, 1]} : vector<8x128xf32> to vector<8x32xf32>
    %299 = vector.extract_strided_slice %296 {offsets = [0, 64], sizes = [8, 32], strides = [1, 1]} : vector<8x128xf32> to vector<8x32xf32>
    %300 = vector.extract_strided_slice %296 {offsets = [0, 96], sizes = [8, 32], strides = [1, 1]} : vector<8x128xf32> to vector<8x32xf32>
    %301 = arith.mulf %298, %279 : vector<8x32xf32>
    %302 = arith.mulf %297, %299 : vector<8x32xf32>
    %303 = arith.addf %301, %302 : vector<8x32xf32>
    %304 = math.tanh %303 : vector<8x32xf32>
    %305 = arith.mulf %300, %304 : vector<8x32xf32>
    %306 = vector.extract_strided_slice %231 {offsets = [24, 0], sizes = [8, 128], strides = [1, 1]} : vector<64x128xf32> to vector<8x128xf32>
    %307 = arith.truncf %305 : vector<8x32xf32> to vector<8x32xbf16>
    %cst_75 = arith.constant dense<0.000000e+00> : vector<8x128xf32>
    %308 = tpu.matmul %307, %225, %cst_75 {dimension_numbers = #tpu.dot_dimension_numbers<[1], [0], [0], [1], [0, 0, 1, 1], [], []>} : vector<8x32xbf16>, vector<32x128xbf16>, vector<8x128xf32> -> vector<8x128xf32>
    %309 = arith.addf %306, %308 : vector<8x128xf32>
    %310 = arith.mulf %309, %15 : vector<8x128xf32>
    %311 = arith.negf %310 : vector<8x128xf32>
    %312 = math.exp %311 : vector<8x128xf32>
    %cst_76 = arith.constant 1.000000e+00 : f32
    %313 = vector.broadcast %cst_76 : f32 to vector<8x128xf32>
    %314 = arith.addf %313, %312 : vector<8x128xf32>
    %315 = arith.divf %313, %314 : vector<8x128xf32>
    %cst_77 = arith.constant 2.000000e+00 : f32
    %316 = vector.broadcast %cst_77 : f32 to vector<8x128xf32>
    %317 = arith.mulf %316, %315 : vector<8x128xf32>
    %cst_78 = arith.constant 1.000000e+00 : f32
    %318 = vector.broadcast %cst_78 : f32 to vector<8x128xf32>
    %319 = arith.subf %317, %318 : vector<8x128xf32>
    %320 = arith.select %12, %319, %315 : vector<8x128xi1>, vector<8x128xf32>
    %321 = vector.extract_strided_slice %320 {offsets = [0, 0], sizes = [8, 32], strides = [1, 1]} : vector<8x128xf32> to vector<8x32xf32>
    %322 = vector.extract_strided_slice %320 {offsets = [0, 32], sizes = [8, 32], strides = [1, 1]} : vector<8x128xf32> to vector<8x32xf32>
    %323 = vector.extract_strided_slice %320 {offsets = [0, 64], sizes = [8, 32], strides = [1, 1]} : vector<8x128xf32> to vector<8x32xf32>
    %324 = vector.extract_strided_slice %320 {offsets = [0, 96], sizes = [8, 32], strides = [1, 1]} : vector<8x128xf32> to vector<8x32xf32>
    %325 = arith.mulf %322, %303 : vector<8x32xf32>
    %326 = arith.mulf %321, %323 : vector<8x32xf32>
    %327 = arith.addf %325, %326 : vector<8x32xf32>
    %328 = math.tanh %327 : vector<8x32xf32>
    %329 = arith.mulf %324, %328 : vector<8x32xf32>
    %330 = vector.extract_strided_slice %231 {offsets = [32, 0], sizes = [8, 128], strides = [1, 1]} : vector<64x128xf32> to vector<8x128xf32>
    %331 = arith.truncf %329 : vector<8x32xf32> to vector<8x32xbf16>
    %cst_79 = arith.constant dense<0.000000e+00> : vector<8x128xf32>
    %332 = tpu.matmul %331, %225, %cst_79 {dimension_numbers = #tpu.dot_dimension_numbers<[1], [0], [0], [1], [0, 0, 1, 1], [], []>} : vector<8x32xbf16>, vector<32x128xbf16>, vector<8x128xf32> -> vector<8x128xf32>
    %333 = arith.addf %330, %332 : vector<8x128xf32>
    %334 = arith.mulf %333, %15 : vector<8x128xf32>
    %335 = arith.negf %334 : vector<8x128xf32>
    %336 = math.exp %335 : vector<8x128xf32>
    %cst_80 = arith.constant 1.000000e+00 : f32
    %337 = vector.broadcast %cst_80 : f32 to vector<8x128xf32>
    %338 = arith.addf %337, %336 : vector<8x128xf32>
    %339 = arith.divf %337, %338 : vector<8x128xf32>
    %cst_81 = arith.constant 2.000000e+00 : f32
    %340 = vector.broadcast %cst_81 : f32 to vector<8x128xf32>
    %341 = arith.mulf %340, %339 : vector<8x128xf32>
    %cst_82 = arith.constant 1.000000e+00 : f32
    %342 = vector.broadcast %cst_82 : f32 to vector<8x128xf32>
    %343 = arith.subf %341, %342 : vector<8x128xf32>
    %344 = arith.select %12, %343, %339 : vector<8x128xi1>, vector<8x128xf32>
    %345 = vector.extract_strided_slice %344 {offsets = [0, 0], sizes = [8, 32], strides = [1, 1]} : vector<8x128xf32> to vector<8x32xf32>
    %346 = vector.extract_strided_slice %344 {offsets = [0, 32], sizes = [8, 32], strides = [1, 1]} : vector<8x128xf32> to vector<8x32xf32>
    %347 = vector.extract_strided_slice %344 {offsets = [0, 64], sizes = [8, 32], strides = [1, 1]} : vector<8x128xf32> to vector<8x32xf32>
    %348 = vector.extract_strided_slice %344 {offsets = [0, 96], sizes = [8, 32], strides = [1, 1]} : vector<8x128xf32> to vector<8x32xf32>
    %349 = arith.mulf %346, %327 : vector<8x32xf32>
    %350 = arith.mulf %345, %347 : vector<8x32xf32>
    %351 = arith.addf %349, %350 : vector<8x32xf32>
    %352 = math.tanh %351 : vector<8x32xf32>
    %353 = arith.mulf %348, %352 : vector<8x32xf32>
    %354 = vector.extract_strided_slice %231 {offsets = [40, 0], sizes = [8, 128], strides = [1, 1]} : vector<64x128xf32> to vector<8x128xf32>
    %355 = arith.truncf %353 : vector<8x32xf32> to vector<8x32xbf16>
    %cst_83 = arith.constant dense<0.000000e+00> : vector<8x128xf32>
    %356 = tpu.matmul %355, %225, %cst_83 {dimension_numbers = #tpu.dot_dimension_numbers<[1], [0], [0], [1], [0, 0, 1, 1], [], []>} : vector<8x32xbf16>, vector<32x128xbf16>, vector<8x128xf32> -> vector<8x128xf32>
    %357 = arith.addf %354, %356 : vector<8x128xf32>
    %358 = arith.mulf %357, %15 : vector<8x128xf32>
    %359 = arith.negf %358 : vector<8x128xf32>
    %360 = math.exp %359 : vector<8x128xf32>
    %cst_84 = arith.constant 1.000000e+00 : f32
    %361 = vector.broadcast %cst_84 : f32 to vector<8x128xf32>
    %362 = arith.addf %361, %360 : vector<8x128xf32>
    %363 = arith.divf %361, %362 : vector<8x128xf32>
    %cst_85 = arith.constant 2.000000e+00 : f32
    %364 = vector.broadcast %cst_85 : f32 to vector<8x128xf32>
    %365 = arith.mulf %364, %363 : vector<8x128xf32>
    %cst_86 = arith.constant 1.000000e+00 : f32
    %366 = vector.broadcast %cst_86 : f32 to vector<8x128xf32>
    %367 = arith.subf %365, %366 : vector<8x128xf32>
    %368 = arith.select %12, %367, %363 : vector<8x128xi1>, vector<8x128xf32>
    %369 = vector.extract_strided_slice %368 {offsets = [0, 0], sizes = [8, 32], strides = [1, 1]} : vector<8x128xf32> to vector<8x32xf32>
    %370 = vector.extract_strided_slice %368 {offsets = [0, 32], sizes = [8, 32], strides = [1, 1]} : vector<8x128xf32> to vector<8x32xf32>
    %371 = vector.extract_strided_slice %368 {offsets = [0, 64], sizes = [8, 32], strides = [1, 1]} : vector<8x128xf32> to vector<8x32xf32>
    %372 = vector.extract_strided_slice %368 {offsets = [0, 96], sizes = [8, 32], strides = [1, 1]} : vector<8x128xf32> to vector<8x32xf32>
    %373 = arith.mulf %370, %351 : vector<8x32xf32>
    %374 = arith.mulf %369, %371 : vector<8x32xf32>
    %375 = arith.addf %373, %374 : vector<8x32xf32>
    %376 = math.tanh %375 : vector<8x32xf32>
    %377 = arith.mulf %372, %376 : vector<8x32xf32>
    %378 = vector.extract_strided_slice %231 {offsets = [48, 0], sizes = [8, 128], strides = [1, 1]} : vector<64x128xf32> to vector<8x128xf32>
    %379 = arith.truncf %377 : vector<8x32xf32> to vector<8x32xbf16>
    %cst_87 = arith.constant dense<0.000000e+00> : vector<8x128xf32>
    %380 = tpu.matmul %379, %225, %cst_87 {dimension_numbers = #tpu.dot_dimension_numbers<[1], [0], [0], [1], [0, 0, 1, 1], [], []>} : vector<8x32xbf16>, vector<32x128xbf16>, vector<8x128xf32> -> vector<8x128xf32>
    %381 = arith.addf %378, %380 : vector<8x128xf32>
    %382 = arith.mulf %381, %15 : vector<8x128xf32>
    %383 = arith.negf %382 : vector<8x128xf32>
    %384 = math.exp %383 : vector<8x128xf32>
    %cst_88 = arith.constant 1.000000e+00 : f32
    %385 = vector.broadcast %cst_88 : f32 to vector<8x128xf32>
    %386 = arith.addf %385, %384 : vector<8x128xf32>
    %387 = arith.divf %385, %386 : vector<8x128xf32>
    %cst_89 = arith.constant 2.000000e+00 : f32
    %388 = vector.broadcast %cst_89 : f32 to vector<8x128xf32>
    %389 = arith.mulf %388, %387 : vector<8x128xf32>
    %cst_90 = arith.constant 1.000000e+00 : f32
    %390 = vector.broadcast %cst_90 : f32 to vector<8x128xf32>
    %391 = arith.subf %389, %390 : vector<8x128xf32>
    %392 = arith.select %12, %391, %387 : vector<8x128xi1>, vector<8x128xf32>
    %393 = vector.extract_strided_slice %392 {offsets = [0, 0], sizes = [8, 32], strides = [1, 1]} : vector<8x128xf32> to vector<8x32xf32>
    %394 = vector.extract_strided_slice %392 {offsets = [0, 32], sizes = [8, 32], strides = [1, 1]} : vector<8x128xf32> to vector<8x32xf32>
    %395 = vector.extract_strided_slice %392 {offsets = [0, 64], sizes = [8, 32], strides = [1, 1]} : vector<8x128xf32> to vector<8x32xf32>
    %396 = vector.extract_strided_slice %392 {offsets = [0, 96], sizes = [8, 32], strides = [1, 1]} : vector<8x128xf32> to vector<8x32xf32>
    %397 = arith.mulf %394, %375 : vector<8x32xf32>
    %398 = arith.mulf %393, %395 : vector<8x32xf32>
    %399 = arith.addf %397, %398 : vector<8x32xf32>
    %400 = math.tanh %399 : vector<8x32xf32>
    %401 = arith.mulf %396, %400 : vector<8x32xf32>
    %402 = vector.extract_strided_slice %231 {offsets = [56, 0], sizes = [8, 128], strides = [1, 1]} : vector<64x128xf32> to vector<8x128xf32>
    %403 = arith.truncf %401 : vector<8x32xf32> to vector<8x32xbf16>
    %cst_91 = arith.constant dense<0.000000e+00> : vector<8x128xf32>
    %404 = tpu.matmul %403, %225, %cst_91 {dimension_numbers = #tpu.dot_dimension_numbers<[1], [0], [0], [1], [0, 0, 1, 1], [], []>} : vector<8x32xbf16>, vector<32x128xbf16>, vector<8x128xf32> -> vector<8x128xf32>
    %405 = arith.addf %402, %404 : vector<8x128xf32>
    %406 = arith.mulf %405, %15 : vector<8x128xf32>
    %407 = arith.negf %406 : vector<8x128xf32>
    %408 = math.exp %407 : vector<8x128xf32>
    %cst_92 = arith.constant 1.000000e+00 : f32
    %409 = vector.broadcast %cst_92 : f32 to vector<8x128xf32>
    %410 = arith.addf %409, %408 : vector<8x128xf32>
    %411 = arith.divf %409, %410 : vector<8x128xf32>
    %cst_93 = arith.constant 2.000000e+00 : f32
    %412 = vector.broadcast %cst_93 : f32 to vector<8x128xf32>
    %413 = arith.mulf %412, %411 : vector<8x128xf32>
    %cst_94 = arith.constant 1.000000e+00 : f32
    %414 = vector.broadcast %cst_94 : f32 to vector<8x128xf32>
    %415 = arith.subf %413, %414 : vector<8x128xf32>
    %416 = arith.select %12, %415, %411 : vector<8x128xi1>, vector<8x128xf32>
    %417 = vector.extract_strided_slice %416 {offsets = [0, 0], sizes = [8, 32], strides = [1, 1]} : vector<8x128xf32> to vector<8x32xf32>
    %418 = vector.extract_strided_slice %416 {offsets = [0, 32], sizes = [8, 32], strides = [1, 1]} : vector<8x128xf32> to vector<8x32xf32>
    %419 = vector.extract_strided_slice %416 {offsets = [0, 64], sizes = [8, 32], strides = [1, 1]} : vector<8x128xf32> to vector<8x32xf32>
    %420 = vector.extract_strided_slice %416 {offsets = [0, 96], sizes = [8, 32], strides = [1, 1]} : vector<8x128xf32> to vector<8x32xf32>
    %421 = arith.mulf %418, %399 : vector<8x32xf32>
    %422 = arith.mulf %417, %419 : vector<8x32xf32>
    %423 = arith.addf %421, %422 : vector<8x32xf32>
    %424 = math.tanh %423 : vector<8x32xf32>
    %425 = arith.mulf %420, %424 : vector<8x32xf32>
    %426 = tpu.concatenate %425, %222 in 1 : vector<8x32xf32>, vector<8x32xf32> -> vector<8x64xf32>
    %427 = arith.truncf %426 : vector<8x64xf32> to vector<8x64xbf16>
    %c0_95 = arith.constant 0 : index
    %c0_96 = arith.constant 0 : index
    %428 = vector.load %arg8[%c0_95, %c0_96] : memref<64x128xbf16, #tpu.memory_space<vmem>>, vector<64x128xbf16>
    %cst_97 = arith.constant dense<0.000000e+00> : vector<8x128xf32>
    %429 = tpu.matmul %427, %428, %cst_97 {dimension_numbers = #tpu.dot_dimension_numbers<[1], [0], [0], [1], [0, 0, 1, 1], [], []>} : vector<8x64xbf16>, vector<64x128xbf16>, vector<8x128xf32> -> vector<8x128xf32>
    %c0_98 = arith.constant 0 : index
    %c0_99 = arith.constant 0 : index
    %430 = vector.load %arg9[%c0_98, %c0_99] : memref<1x128xf32, #tpu.memory_space<vmem>>, vector<1x128xf32>
    %431 = vector.broadcast %430 : vector<1x128xf32> to vector<8x128xf32>
    %432 = arith.addf %429, %431 : vector<8x128xf32>
    %cst_100 = arith.constant 0.000000e+00 : f32
    %433 = vector.broadcast %cst_100 : f32 to vector<8x128xf32>
    %434 = arith.maximumf %432, %433 : vector<8x128xf32>
    %c0_101 = arith.constant 0 : index
    %c0_102 = arith.constant 0 : index
    %435 = vector.load %arg10[%c0_101, %c0_102] : memref<8x128xf32, #tpu.memory_space<vmem>>, vector<8x128xf32>
    tpu.vector_store %arg10[%c0_101, %c0_102], %434 {strides = array<i32>} : memref<8x128xf32, #tpu.memory_space<vmem>>, vector<8x128xf32>,
    return
  }
  func.func @transform_0(%arg0: i32) -> (i32, i32) {
    %c0_i32 = arith.constant 0 : i32
    %c0_i32_0 = arith.constant 0 : i32
    %c0_i32_1 = arith.constant 0 : i32
    return %c0_i32, %c0_i32_0 : i32, i32
  }
  func.func @transform_1(%arg0: i32) -> (i32, i32) {
    %c0_i32 = arith.constant 0 : i32
    %c0_i32_0 = arith.constant 0 : i32
    %c0_i32_1 = arith.constant 0 : i32
    return %c0_i32, %c0_i32_0 : i32, i32
  }
  func.func @transform_2(%arg0: i32) -> (i32, i32) {
    %c0_i32 = arith.constant 0 : i32
    %c0_i32_0 = arith.constant 0 : i32
    %c0_i32_1 = arith.constant 0 : i32
    return %c0_i32, %c0_i32_0 : i32, i32
  }
  func.func @transform_3(%arg0: i32) -> (i32, i32) {
    %c0_i32 = arith.constant 0 : i32
    %c0_i32_0 = arith.constant 0 : i32
    %c0_i32_1 = arith.constant 0 : i32
    return %c0_i32, %c0_i32_0 : i32, i32
  }
  func.func @transform_4(%arg0: i32) -> (i32, i32) {
    %c0_i32 = arith.constant 0 : i32
    %c0_i32_0 = arith.constant 0 : i32
    %c0_i32_1 = arith.constant 0 : i32
    return %c0_i32, %c0_i32_0 : i32, i32
  }
  func.func @transform_5(%arg0: i32) -> (i32, i32) {
    %c0_i32 = arith.constant 0 : i32
    %c0_i32_0 = arith.constant 0 : i32
    %c0_i32_1 = arith.constant 0 : i32
    return %c0_i32, %c0_i32_0 : i32, i32
  }
  func.func @transform_6(%arg0: i32) -> (i32, i32) {
    %c0_i32 = arith.constant 0 : i32
    %c0_i32_0 = arith.constant 0 : i32
    %c0_i32_1 = arith.constant 0 : i32
    return %c0_i32, %c0_i32_0 : i32, i32
  }
  func.func @transform_7(%arg0: i32) -> (i32, i32) {
    %c0_i32 = arith.constant 0 : i32
    %c0_i32_0 = arith.constant 0 : i32
    %c0_i32_1 = arith.constant 0 : i32
    return %c0_i32, %c0_i32_0 : i32, i32
  }
  func.func @transform_8(%arg0: i32) -> (i32, i32) {
    %c0_i32 = arith.constant 0 : i32
    %c0_i32_0 = arith.constant 0 : i32
    %c0_i32_1 = arith.constant 0 : i32
    return %c0_i32, %c0_i32_0 : i32, i32
  }
  func.func @transform_9(%arg0: i32) -> (i32, i32) {
    %c0_i32 = arith.constant 0 : i32
    %c0_i32_0 = arith.constant 0 : i32
    %c0_i32_1 = arith.constant 0 : i32
    return %c0_i32, %c0_i32_0 : i32, i32
  }
}

</mosaic_0001>

<bundles_post_ra>
// kernel: rnn_composition_forward.1
= control target key start
LH: loop header
LB: loop body
LE: loop exit
PB: predicated region body
PF: predicated region fallthrough
CT: control target
= control target key end

     0   :  { %14 = vsyncpa [#allocation4], 0  ;;  %s2211_s0 = inlined_call_operand.vmem [shape: s32[64,1], index: 0, kind: input, shape index: {}]   ;;  %s2212_s1 = inlined_call_operand.vmem [shape: bf16[128,128], index: 1, kind: input, shape index: {}]   ;;  %s2213_s2 = inlined_call_operand.hbm [shape: bf16[32,128], index: 2, kind: input, shape index: {}]   ;;  %s2214_s3 = inlined_call_operand.vmem [shape: f32[1,128], index: 3, kind: input, shape index: {}]   ;;  %s2215_s4 = inlined_call_operand.hbm [shape: bf16[32,128], index: 4, kind: input, shape index: {}]   ;;  %s2216_s5 = inlined_call_operand.hbm [shape: bf16[32,128], index: 5, kind: input, shape index: {}]   ;;  %s2217_s6 = inlined_call_operand.vmem [shape: f32[1,128], index: 6, kind: input, shape index: {}]   ;;  %s2218_s7 = inlined_call_operand.vmem [shape: bf16[64,128], index: 7, kind: input, shape index: {}]   ;;  %s2219_s8 = inlined_call_operand.vmem [shape: f32[1,128], index: 8, kind: input, shape index: {}]   ;;  %s2220_s9 = inlined_call_operand.vmem [shape: f32[8,128], index: 9, kind: output, shape index: {}]  }
   0x1   :  { %15 = vsyncpa [#allocation6], 0  ;;  %s39_s11 = sshll.u32 %s2215_s4, 4  ;;  %s1769_s12 = smov [#allocation5]   ;;  %s40_s11 = int_to_ptr.hbm [resolvable:$true] %s39_s11 }
   0x2   :  { %s41_s13 = sshll.u32 %s1769_s12, 4  ;;  %s24_s16 = sshll.u32 %s2213_s2, 4  ;;  %s42_s13 = int_to_ptr.vmem [resolvable:$true] %s41_s13  ;;  %s25_s16 = int_to_ptr.hbm [resolvable:$true] %s24_s16 }
   0x3   :  { %s1770_s17 = smov 64   ;;  %s1771_s18 = smov 4  }
   0x4   :  { %47 = dma.hbm_to_vmem [thread:$0]  %s40_s11, 256, %s42_s13, [#allocation6], %s1770_s17, %s1770_s17, %s1771_s18  }
   0x5   :  { %s1772_s19 = smov [#allocation3]   ;;  %s52_s4 = sshll.u32 %s2216_s5, 4  ;;  %s53_s4 = int_to_ptr.hbm [resolvable:$true] %s52_s4 }
   0x6   :  { %s26_s20 = sshll.u32 %s1772_s19, 4  ;;  %s1773_s23 = smov [#allocation7]   ;;  %s27_s20 = int_to_ptr.vmem [resolvable:$true] %s26_s20 }
   0x7   :  { %32 = dma.hbm_to_vmem [thread:$0]  %s25_s16, 256, %s27_s20, [#allocation4], %s1770_s17, %s1770_s17, %s1771_s18  }
   0x8   :  { %s54_s24 = sshll.u32 %s1773_s23, 4  ;;  %s55_s24 = int_to_ptr.vmem [resolvable:$true] %s54_s24 }
   0x9   :  { %60 = dma.hbm_to_vmem [thread:$0]  %s53_s4, 256, %s55_s24, [#allocation6], %s1770_s17, %s1770_s17, %s1771_s18  }
   0xa   :  { %1765 = dma.done.wait [#allocation4], 256  }
   0xb   :  { %1766 = vsyncadd [#allocation4], 4294967040 }
   0xc   :  { %1767 = dma.done.wait [#allocation6], 512  }
   0xd   :  { %1768 = vsyncadd [#allocation6], 4294966784  ;;  %v1774_v0 = vmov 0   ;;  %v80_v1 = vld [vmem:[%s2211_s0] sm:$0xff]  ;;  %v1570_v2 = vld [vmem:[%s2212_s1 + $0x38] sm:$0xff]  ;;  %v88_v14 = vlaneseq  ;;  %v1776_v24 = vmov 1.0  }
   0xe   :  { %1590 = vset.pattern.permute.xlu0 %v1774_v0  ;;  %1591 = vset.pattern.permute.xlu1 %v1774_v0  ;;  %v1569_v3 = vld [vmem:[%s2212_s1 + $0x30] sm:$0xff]  ;;  %v1855_v4 = vld [vmem:[#allocation3 + $0x8] sm:$0xff]  ;;  %v1567_v7 = vld [vmem:[%s2212_s1 + $0x20] sm:$0xff]  ;;  %v1775_v17 = vmov 1.0|1.0   ;;  %s1777_s23 = smov 32  }
   0xf   :  { %1592 = vset.pattern.permute.xlu2 %v1774_v0  ;;  %91 = vperm.xlu0 %1590, %v80_v1   ;;  %v81_v5 = vld [vmem:[%s2211_s0 + $0x8] sm:$0xff]  ;;  %v1566_v8 = vld [vmem:[%s2212_s1 + $0x18] sm:$0xff]  ;;  %v1565_v9 = vld [vmem:[%s2212_s1 + $0x10] sm:$0xff]  ;;  %v1895_v15 = vand.u32 127, %v88_v14  ;;  %vm259_vm10 = vcmask 261120  }
  0x10   :  { %218 = vmatpush.bf16.msra.mxu0 %v1570_v2  ;;  %269 = vmatpush.bf16.msra.mxu1 %v1855_v4  ;;  %v1568_v6 = vld [vmem:[%s2212_s1 + $0x28] sm:$0xff]  ;;  %v1875_v10 = vld [vmem:[#allocation3] sm:$0xff]  ;;  %v1580_v21 = vld [vmem:[%s2218_s7 + $0x18] sm:$0xff] }
  0x11   :  { %335 = vmatpush.bf16.msra.mxu2 %v1855_v4  ;;  %401 = vmatpush.bf16.msra.mxu3 %v1855_v4  ;;  %v1564_v11 = vld [vmem:[%s2212_s1 + $0x8] sm:$0xff]  ;;  %v1563_v12 = vld [vmem:[%s2212_s1] sm:$0xff]  ;;  %vm142_vm3 = vcmp.ge.s32.totalorder %v1895_v15, 64  ;;  %vm143_vm4 = vcmp.lt.s32.totalorder %v1895_v15, 96 }
  0x12   :  { %v1905_v20 = vld [vmem:[%s2214_s3] ss:$0 sm:$0xff]  ;;  %vm1907_vm5 = vmand %vm142_vm3, %vm143_vm4 }
  0x13   :  { %v1914_v25 = vsel %vm1907_vm5, 2.0, %v1776_v24  ;;  %v83_v24 = vld [vmem:[%s2211_s0 + $0x18] sm:$0xff] }
  0x14   :  { %219 = vmatpush.bf16.msra.mxu0 %v1569_v3  ;;  %270 = vmatpush.bf16.msra.mxu1 %v1875_v10 }
  0x15   :  { %336 = vmatpush.bf16.msra.mxu2 %v1875_v10  ;;  %402 = vmatpush.bf16.msra.mxu3 %v1875_v10 }
  0x17   :  { %94 = vperm.xlu0 %1590, %v81_v5   ;;  %271 = vmatmul.bf16.vlgmr.msra.gmra.mxu1 %v1774_v0 }
  0x18   :  { %220 = vmatpush.bf16.msra.mxu0 %v1568_v6  ;;  %467 = vmatpush.bf16.msrb.mxu1 %v1855_v4 }
  0x19   :  { %533 = vmatpush.bf16.msrb.mxu2 %v1855_v4  ;;  %599 = vmatpush.bf16.msrb.mxu3 %v1855_v4 }
  0x1c   :  { %221 = vmatpush.bf16.msra.mxu0 %v1567_v7  ;;  %468 = vmatpush.bf16.msrb.mxu1 %v1875_v10 }
  0x1d   :  { %534 = vmatpush.bf16.msrb.mxu2 %v1875_v10  ;;  %600 = vmatpush.bf16.msrb.mxu3 %v1875_v10 }
  0x20   :  { %222 = vmatpush.bf16.msra.mxu0 %v1566_v8  ;;  %665 = vmatpush.bf16.msra.mxu1 %v1855_v4 }
  0x24   :  { %223 = vmatpush.bf16.msra.mxu0 %v1565_v9  ;;  %666 = vmatpush.bf16.msra.mxu1 %v1875_v10 }
  0x28   :  { %224 = vmatpush.bf16.msra.mxu0 %v1564_v11 }
  0x2c   :  { %225 = vmatpush.bf16.msra.mxu0 %v1563_v12 }
  0x81   :  { %v92_v13 = vpop.permute.xlu0 %91 }
  0x82   :  { %vm114_vm0 = vcmp.eq.s32.totalorder %v1895_v15, %v92_v13 }
  0x89   :  { %v95_v16 = vpop.permute.xlu0 %94 }
  0x8a   :  { %vm115_vm1 = vcmp.eq.s32.totalorder %v1895_v15, %v95_v16  ;;  %v82_v16 = vld [vmem:[%s2211_s0 + $0x10] sm:$0xff] }
  0x8b   :  { %vm1464_vm2 = vmpackc.low %vm115_vm1, %vm114_vm0 }
  0x8c   :  { %1465 = vmatmul.msk.bf16.vlgmr.msra.gmra.mxu0 %vm1464_vm2, %v1775_v17 }
  0x94   :  { %v272_v18 = vpop.f32.mrf.mxu1 }
  0x9c   :  { %v274_v19 = vpop.f32.mrf.mxu1 }
 0x109   :  { %v227_v22 = vpop.f32.mrf.mxu0 }
 0x10a   :  { %v228_v23 = vadd.f32 %v1905_v20, %v227_v22 }
 0x10c   :  { %v276_v26 = vadd.f32 %v272_v18, %v228_v23 }
 0x10e   :  { %v277_v27 = vmul.f32 %v276_v26, %v1914_v25 }
 0x110   :  { %v1480_v28 = vmul.f32 -1.442695, %v277_v27 }
 0x111   :  { %v229_v54 = vpop.f32.mrf.mxu0 }
 0x112   :  { %1596 = vpow2.f32 %v1480_v28  ;;  %v230_v55 = vadd.f32 %v1905_v20, %v229_v54 }
 0x118   :  { %v1597_v29 = vpop.eup %1596 }
 0x119   :  { %v281_v30 = vadd.f32 1.0, %v1597_v29 }
 0x11b   :  { %1598 = vrcp.f32 %v281_v30  ;;  %v293_v34 = vand.u32 2147483648, %v281_v30  ;;  %v291_v36 = vand.u32 2147483647, %v281_v30  ;;  %vm287_vm7 = vweird.f32 %v281_v30 }
 0x11d   :  { %v294_v38 = vor.u32 1.1754944e-38, %v293_v34  ;;  %vm292_vm9 = vcmp.eq.f32.partialorder %v291_v36, 8.507059e+37 }
 0x121   :  { %v1599_v31 = vpop.eup %1598 }
 0x122   :  { %v283_v32 = vmul.f32 %v1599_v31, %v281_v30  ;;  %vm288_vm6 = vweird.f32 %v1599_v31 }
 0x123   :  { %vm289_vm8 = vmor %vm287_vm7, %vm288_vm6 }
 0x124   :  { %v284_v33 = vsub.f32 1.0, %v283_v32 }
 0x126   :  { %v285_v35 = vmul.f32 %v1599_v31, %v284_v33 }
 0x128   :  { %v286_v37 = vadd.f32 %v1599_v31, %v285_v35 }
 0x12a   :  { %v290_v39 = vsel %vm289_vm8, %v1599_v31, %v286_v37 }
 0x12b   :  { %v295_v40 = vsel %vm292_vm9, %v294_v38, %v290_v39 }
 0x12c   :  { %v297_v41 = vmul.f32 2.0, %v295_v40 }
 0x12e   :  { %v1481_v42 = vadd.f32 -1.0, %v297_v41 }
 0x130   :  { %v299_v43 = vsel %vm1907_vm5, %v1481_v42, %v295_v40 }
 0x131   :  { %302 = vrot.lane.b32.xlu1 %v299_v43, %s1770_s17  ;;  %v300_v46 = vmul.f32 0.0, %v299_v43 }
 0x1a3   :  { %v303_v44 = vpop.permute.xlu1 %302 }
 0x1a4   :  { %v305_v45 = vmul.f32 %v303_v44, %v299_v43 }
 0x1a6   :  { %307 = vrot.lane.b32.xlu1 %v305_v45, %s1777_s23 }
 0x218   :  { %v308_v47 = vpop.permute.xlu1 %307 }
 0x219   :  { %v310_v48 = vadd.f32 %v308_v47, %v300_v46 }
 0x21b   :  { %1600 = vtanh.f32 %v310_v48 }
 0x221   :  { %v1601_v49 = vpop.eup %1600 }
 0x222   :  { %313 = vrot.lane.b32.xlu2 %v1601_v49, %s1770_s17 }
 0x27c   :  { %v314_v50 = vpop.permute.xlu2 %313 }
 0x27d   :  { %v1922_v51 = vmul.f32 %v314_v50, %v299_v43 }
 0x27f   :  { %v322_v52 = vpack.c.bf16 %v1922_v51, %v1922_v51 }
 0x281   :  { %324 = vrot.lane.b32.xlu2 %v322_v52, %s1777_s23 }
 0x2db   :  { %v325_v53 = vpop.permute.xlu2 %324 }
 0x2dc   :  { %1482 = vmatmul.msk.bf16.vlgmr.msra.gmra.mxu2 %vm259_vm10, %v325_v53 }
 0x2dd   :  { %731 = vmatpush.bf16.msra.mxu2 %v1855_v4 }
 0x2e1   :  { %732 = vmatpush.bf16.msra.mxu2 %v1875_v10 }
 0x35f   :  { %v338_v56 = vpop.f32.mrf.mxu2 }
 0x360   :  { %v342_v57 = vadd.f32 %v338_v56, %v230_v55 }
 0x362   :  { %v343_v58 = vmul.f32 %v342_v57, %v1914_v25 }
 0x364   :  { %v1483_v59 = vmul.f32 -1.442695, %v343_v58 }
 0x366   :  { %1602 = vpow2.f32 %v1483_v59 }
 0x367   :  { %v340_v60 = vpop.f32.mrf.mxu2 }
 0x36c   :  { %v1603_v61 = vpop.eup %1602 }
 0x36d   :  { %v347_v62 = vadd.f32 1.0, %v1603_v61 }
 0x36f   :  { %1604 = vrcp.f32 %v347_v62  ;;  %v359_v3 = vand.u32 2147483648, %v347_v62  ;;  %v357_v5 = vand.u32 2147483647, %v347_v62  ;;  %vm353_vm12 = vweird.f32 %v347_v62 }
 0x371   :  { %v360_v7 = vor.u32 1.1754944e-38, %v359_v3  ;;  %vm358_vm14 = vcmp.eq.f32.partialorder %v357_v5, 8.507059e+37 }
 0x375   :  { %v1605_v63 = vpop.eup %1604 }
 0x376   :  { %v349_v1 = vmul.f32 %v1605_v63, %v347_v62  ;;  %vm354_vm11 = vweird.f32 %v1605_v63 }
 0x377   :  { %vm355_vm13 = vmor %vm353_vm12, %vm354_vm11 }
 0x378   :  { %v350_v2 = vsub.f32 1.0, %v349_v1 }
 0x37a   :  { %v351_v4 = vmul.f32 %v1605_v63, %v350_v2 }
 0x37c   :  { %v352_v6 = vadd.f32 %v1605_v63, %v351_v4 }
 0x37e   :  { %v356_v8 = vsel %vm355_vm13, %v1605_v63, %v352_v6 }
 0x37f   :  { %v361_v9 = vsel %vm358_vm14, %v360_v7, %v356_v8 }
 0x380   :  { %v363_v10 = vmul.f32 2.0, %v361_v9 }
 0x382   :  { %v1484_v11 = vadd.f32 -1.0, %v363_v10 }
 0x384   :  { %v365_v12 = vsel %vm1907_vm5, %v1484_v11, %v361_v9 }
 0x385   :  { %368 = vrot.lane.b32.xlu0 %v365_v12, %s1770_s17  ;;  %v366_v18 = vmul.f32 %v365_v12, %v310_v48 }
 0x3f7   :  { %v369_v13 = vpop.permute.xlu0 %368 }
 0x3f8   :  { %v371_v14 = vmul.f32 %v369_v13, %v365_v12 }
 0x3fa   :  { %373 = vrot.lane.b32.xlu1 %v371_v14, %s1777_s23 }
 0x402   :  { %97 = vperm.xlu1 %1591, %v82_v16  }
 0x46c   :  { %v374_v19 = vpop.permute.xlu1 %373 }
 0x46d   :  { %v376_v22 = vadd.f32 %v374_v19, %v366_v18 }
 0x46f   :  { %1606 = vtanh.f32 %v376_v22 }
 0x474   :  { %v98_v29 = vpop.permute.xlu1 %97 }
 0x475   :  { %v1607_v23 = vpop.eup %1606  ;;  %vm116_vm15 = vcmp.eq.s32.totalorder %v1895_v15, %v98_v29 }
 0x476   :  { %379 = vrot.lane.b32.xlu2 %v1607_v23, %s1770_s17 }
 0x47e   :  { %100 = vperm.xlu2 %1592, %v83_v24  }
 0x4d0   :  { %v380_v26 = vpop.permute.xlu2 %379 }
 0x4d1   :  { %v1943_v27 = vmul.f32 %v380_v26, %v365_v12 }
 0x4d3   :  { %v388_v28 = vpack.c.bf16 %v1943_v27, %v1943_v27 }
 0x4d5   :  { %390 = vrot.lane.b32.xlu0 %v388_v28, %s1777_s23 }
 0x4d8   :  { %v101_v30 = vpop.permute.xlu2 %100 }
 0x4d9   :  { %vm117_vm0 = vcmp.eq.s32.totalorder %v1895_v15, %v101_v30 }
 0x4da   :  { %vm1466_vm1 = vmpackc.low %vm117_vm0, %vm116_vm15 }
 0x4db   :  { %1467 = vmatmul.msk.bf16.gmra.mxu0 %vm1466_vm1, %v1775_v17 }
 0x547   :  { %v391_v31 = vpop.permute.xlu0 %390 }
 0x548   :  { %1485 = vmatmul.msk.bf16.vlgmr.msra.gmra.mxu3 %vm259_vm10, %v391_v31 }
 0x558   :  { %v232_v32 = vpop.f32.mrf.mxu0 }
 0x559   :  { %v233_v33 = vadd.f32 %v1905_v20, %v232_v32  ;;  %v84_v32 = vld [vmem:[%s2211_s0 + $0x20] sm:$0xff] }
 0x560   :  { %v234_v2 = vpop.f32.mrf.mxu0 }
 0x561   :  { %v235_v3 = vadd.f32 %v1905_v20, %v234_v2 }
 0x5cb   :  { %v404_v34 = vpop.f32.mrf.mxu3 }
 0x5cc   :  { %v408_v35 = vadd.f32 %v404_v34, %v233_v33 }
 0x5ce   :  { %v409_v36 = vmul.f32 %v408_v35, %v1914_v25 }
 0x5d0   :  { %v1486_v37 = vmul.f32 -1.442695, %v409_v36 }
 0x5d2   :  { %1608 = vpow2.f32 %v1486_v37  ;;  %v85_v37 = vld [vmem:[%s2211_s0 + $0x28] sm:$0xff] }
 0x5d3   :  { %v406_v38 = vpop.f32.mrf.mxu3 }
 0x5d8   :  { %v1609_v39 = vpop.eup %1608 }
 0x5d9   :  { %v413_v40 = vadd.f32 1.0, %v1609_v39 }
 0x5db   :  { %1610 = vrcp.f32 %v413_v40  ;;  %v425_v44 = vand.u32 2147483648, %v413_v40  ;;  %v423_v46 = vand.u32 2147483647, %v413_v40  ;;  %vm419_vm3 = vweird.f32 %v413_v40 }
 0x5dd   :  { %v426_v48 = vor.u32 1.1754944e-38, %v425_v44  ;;  %vm424_vm6 = vcmp.eq.f32.partialorder %v423_v46, 8.507059e+37 }
 0x5e1   :  { %v1611_v41 = vpop.eup %1610 }
 0x5e2   :  { %v415_v42 = vmul.f32 %v1611_v41, %v413_v40  ;;  %vm420_vm2 = vweird.f32 %v1611_v41 }
 0x5e3   :  { %vm421_vm4 = vmor %vm419_vm3, %vm420_vm2 }
 0x5e4   :  { %v416_v43 = vsub.f32 1.0, %v415_v42 }
 0x5e6   :  { %v417_v45 = vmul.f32 %v1611_v41, %v416_v43 }
 0x5e8   :  { %v418_v47 = vadd.f32 %v1611_v41, %v417_v45 }
 0x5ea   :  { %v422_v49 = vsel %vm421_vm4, %v1611_v41, %v418_v47 }
 0x5eb   :  { %v427_v50 = vsel %vm424_vm6, %v426_v48, %v422_v49 }
 0x5ec   :  { %v429_v52 = vmul.f32 2.0, %v427_v50 }
 0x5ee   :  { %v1487_v53 = vadd.f32 -1.0, %v429_v52 }
 0x5f0   :  { %v431_v54 = vsel %vm1907_vm5, %v1487_v53, %v427_v50 }
 0x5f1   :  { %434 = vrot.lane.b32.xlu0 %v431_v54, %s1770_s17  ;;  %v432_v57 = vmul.f32 %v431_v54, %v376_v22 }
 0x663   :  { %v435_v55 = vpop.permute.xlu0 %434 }
 0x664   :  { %v437_v56 = vmul.f32 %v435_v55, %v431_v54 }
 0x666   :  { %439 = vrot.lane.b32.xlu1 %v437_v56, %s1777_s23 }
 0x6d8   :  { %v440_v58 = vpop.permute.xlu1 %439 }
 0x6d9   :  { %v442_v59 = vadd.f32 %v440_v58, %v432_v57 }
 0x6db   :  { %1612 = vtanh.f32 %v442_v59 }
 0x6e1   :  { %v1613_v60 = vpop.eup %1612 }
 0x6e2   :  { %445 = vrot.lane.b32.xlu2 %v1613_v60, %s1770_s17 }
 0x73c   :  { %v446_v61 = vpop.permute.xlu2 %445 }
 0x73d   :  { %v1959_v62 = vmul.f32 %v446_v61, %v431_v54 }
 0x73f   :  { %v454_v63 = vpack.c.bf16 %v1959_v62, %v1959_v62 }
 0x741   :  { %456 = vrot.lane.b32.xlu0 %v454_v63, %s1777_s23 }
 0x7b3   :  { %v457_v1 = vpop.permute.xlu0 %456 }
 0x7b4   :  { %1488 = vmatmul.msk.bf16.vlgmr.msrb.gmra.mxu1 %vm259_vm10, %v457_v1 }
 0x831   :  { %v470_v4 = vpop.f32.mrf.mxu1 }
 0x832   :  { %v474_v5 = vadd.f32 %v470_v4, %v235_v3 }
 0x834   :  { %v475_v6 = vmul.f32 %v474_v5, %v1914_v25 }
 0x836   :  { %v1489_v7 = vmul.f32 -1.442695, %v475_v6 }
 0x838   :  { %1614 = vpow2.f32 %v1489_v7 }
 0x839   :  { %v472_v8 = vpop.f32.mrf.mxu1 }
 0x83e   :  { %v1615_v9 = vpop.eup %1614 }
 0x83f   :  { %v479_v10 = vadd.f32 1.0, %v1615_v9 }
 0x841   :  { %1616 = vrcp.f32 %v479_v10  ;;  %v491_v14 = vand.u32 2147483648, %v479_v10  ;;  %v489_v18 = vand.u32 2147483647, %v479_v10  ;;  %vm485_vm8 = vweird.f32 %v479_v10 }
 0x843   :  { %v492_v22 = vor.u32 1.1754944e-38, %v491_v14  ;;  %vm490_vm11 = vcmp.eq.f32.partialorder %v489_v18, 8.507059e+37 }
 0x847   :  { %v1617_v11 = vpop.eup %1616 }
 0x848   :  { %v481_v12 = vmul.f32 %v1617_v11, %v479_v10  ;;  %vm486_vm7 = vweird.f32 %v1617_v11 }
 0x849   :  { %vm487_vm9 = vmor %vm485_vm8, %vm486_vm7 }
 0x84a   :  { %v482_v13 = vsub.f32 1.0, %v481_v12 }
 0x84c   :  { %v483_v16 = vmul.f32 %v1617_v11, %v482_v13 }
 0x84e   :  { %v484_v19 = vadd.f32 %v1617_v11, %v483_v16 }
 0x850   :  { %v488_v23 = vsel %vm487_vm9, %v1617_v11, %v484_v19 }
 0x851   :  { %v493_v24 = vsel %vm490_vm11, %v492_v22, %v488_v23 }
 0x852   :  { %v495_v26 = vmul.f32 2.0, %v493_v24 }
 0x854   :  { %v1490_v28 = vadd.f32 -1.0, %v495_v26 }
 0x856   :  { %v497_v29 = vsel %vm1907_vm5, %v1490_v28, %v493_v24 }
 0x857   :  { %500 = vrot.lane.b32.xlu1 %v497_v29, %s1770_s17  ;;  %v498_v33 = vmul.f32 %v497_v29, %v442_v59 }
 0x8c9   :  { %v501_v30 = vpop.permute.xlu1 %500 }
 0x8ca   :  { %v503_v31 = vmul.f32 %v501_v30, %v497_v29 }
 0x8cc   :  { %505 = vrot.lane.b32.xlu2 %v503_v31, %s1777_s23 }
 0x8d4   :  { %103 = vperm.xlu2 %1592, %v84_v32  }
 0x926   :  { %v506_v34 = vpop.permute.xlu2 %505 }
 0x927   :  { %v508_v35 = vadd.f32 %v506_v34, %v498_v33 }
 0x929   :  { %1618 = vtanh.f32 %v508_v35 }
 0x92e   :  { %v104_v41 = vpop.permute.xlu2 %103 }
 0x92f   :  { %v1619_v36 = vpop.eup %1618  ;;  %vm118_vm12 = vcmp.eq.s32.totalorder %v1895_v15, %v104_v41 }
 0x930   :  { %511 = vrot.lane.b32.xlu0 %v1619_v36, %s1770_s17 }
 0x938   :  { %106 = vperm.xlu0 %1590, %v85_v37  }
 0x9a2   :  { %v512_v38 = vpop.permute.xlu0 %511 }
 0x9a3   :  { %v1978_v39 = vmul.f32 %v512_v38, %v497_v29 }
 0x9a5   :  { %v520_v40 = vpack.c.bf16 %v1978_v39, %v1978_v39 }
 0x9a7   :  { %522 = vrot.lane.b32.xlu1 %v520_v40, %s1777_s23 }
 0x9aa   :  { %v107_v42 = vpop.permute.xlu0 %106 }
 0x9ab   :  { %vm119_vm13 = vcmp.eq.s32.totalorder %v1895_v15, %v107_v42 }
 0x9ac   :  { %vm1468_vm14 = vmpackc.low %vm119_vm13, %vm118_vm12 }
 0x9ad   :  { %1469 = vmatmul.msk.bf16.gmra.mxu0 %vm1468_vm14, %v1775_v17 }
 0xa19   :  { %v523_v43 = vpop.permute.xlu1 %522 }
 0xa1a   :  { %1491 = vmatmul.msk.bf16.vlgmr.msrb.gmra.mxu2 %vm259_vm10, %v523_v43 }
 0xa2a   :  { %v237_v44 = vpop.f32.mrf.mxu0 }
 0xa2b   :  { %v238_v45 = vadd.f32 %v1905_v20, %v237_v44  ;;  %v86_v44 = vld [vmem:[%s2211_s0 + $0x30] sm:$0xff] }
 0xa32   :  { %v239_v16 = vpop.f32.mrf.mxu0 }
 0xa33   :  { %v240_v18 = vadd.f32 %v1905_v20, %v239_v16 }
 0xa9d   :  { %v536_v46 = vpop.f32.mrf.mxu2 }
 0xa9e   :  { %v540_v47 = vadd.f32 %v536_v46, %v238_v45 }
 0xaa0   :  { %v541_v48 = vmul.f32 %v540_v47, %v1914_v25 }
 0xaa2   :  { %v1492_v49 = vmul.f32 -1.442695, %v541_v48  ;;  %v87_v48 = vld [vmem:[%s2211_s0 + $0x38] sm:$0xff] }
 0xaa4   :  { %1620 = vpow2.f32 %v1492_v49 }
 0xaa5   :  { %v538_v50 = vpop.f32.mrf.mxu2 }
 0xaaa   :  { %v1621_v52 = vpop.eup %1620 }
 0xaab   :  { %v545_v53 = vadd.f32 1.0, %v1621_v52 }
 0xaad   :  { %1622 = vrcp.f32 %v545_v53  ;;  %v557_v57 = vand.u32 2147483648, %v545_v53  ;;  %v555_v59 = vand.u32 2147483647, %v545_v53  ;;  %vm551_vm0 = vweird.f32 %v545_v53 }
 0xaaf   :  { %v558_v61 = vor.u32 1.1754944e-38, %v557_v57  ;;  %vm556_vm2 = vcmp.eq.f32.partialorder %v555_v59, 8.507059e+37 }
 0xab3   :  { %v1623_v54 = vpop.eup %1622 }
 0xab4   :  { %v547_v55 = vmul.f32 %v1623_v54, %v545_v53  ;;  %vm552_vm15 = vweird.f32 %v1623_v54 }
 0xab5   :  { %vm553_vm1 = vmor %vm551_vm0, %vm552_vm15 }
 0xab6   :  { %v548_v56 = vsub.f32 1.0, %v547_v55  ;;  %v1574_v55 = vld [vmem:[#allocation5 + $0x8] sm:$0xff] }
 0xab7   :  { %838 = vmatpush.bf16.msra.mxu3 %v1574_v55 }
 0xab8   :  { %v549_v58 = vmul.f32 %v1623_v54, %v548_v56  ;;  %v1573_v56 = vld [vmem:[#allocation5] sm:$0xff] }
 0xaba   :  { %v550_v60 = vadd.f32 %v1623_v54, %v549_v58 }
 0xabb   :  { %839 = vmatpush.bf16.msra.mxu3 %v1573_v56 }
 0xabc   :  { %v554_v63 = vsel %vm553_vm1, %v1623_v54, %v550_v60 }
 0xabd   :  { %v559_v1 = vsel %vm556_vm2, %v558_v61, %v554_v63  ;;  %v2034_v63 = vld [vmem:[#allocation7] sm:$0xff] }
 0xabe   :  { %v561_v2 = vmul.f32 2.0, %v559_v1 }
 0xac0   :  { %v1493_v3 = vadd.f32 -1.0, %v561_v2 }
 0xac2   :  { %v563_v4 = vsel %vm1907_vm5, %v1493_v3, %v559_v1 }
 0xac3   :  { %566 = vrot.lane.b32.xlu1 %v563_v4, %s1770_s17  ;;  %v564_v7 = vmul.f32 %v563_v4, %v508_v35 }
 0xb35   :  { %v567_v5 = vpop.permute.xlu1 %566 }
 0xb36   :  { %v569_v6 = vmul.f32 %v567_v5, %v563_v4 }
 0xb38   :  { %571 = vrot.lane.b32.xlu2 %v569_v6, %s1777_s23 }
 0xb92   :  { %v572_v8 = vpop.permute.xlu2 %571 }
 0xb93   :  { %v574_v9 = vadd.f32 %v572_v8, %v564_v7 }
 0xb95   :  { %1624 = vtanh.f32 %v574_v9 }
 0xb9b   :  { %v1625_v10 = vpop.eup %1624 }
 0xb9c   :  { %577 = vrot.lane.b32.xlu0 %v1625_v10, %s1770_s17 }
 0xc0e   :  { %v578_v11 = vpop.permute.xlu0 %577 }
 0xc0f   :  { %v1994_v12 = vmul.f32 %v578_v11, %v563_v4 }
 0xc11   :  { %v586_v13 = vpack.c.bf16 %v1994_v12, %v1994_v12 }
 0xc13   :  { %588 = vrot.lane.b32.xlu1 %v586_v13, %s1777_s23 }
 0xc85   :  { %v589_v14 = vpop.permute.xlu1 %588 }
 0xc86   :  { %1494 = vmatmul.msk.bf16.vlgmr.msrb.gmra.mxu3 %vm259_vm10, %v589_v14 }
 0xd09   :  { %v602_v19 = vpop.f32.mrf.mxu3 }
 0xd0a   :  { %v606_v22 = vadd.f32 %v602_v19, %v240_v18 }
 0xd0c   :  { %v607_v23 = vmul.f32 %v606_v22, %v1914_v25 }
 0xd0e   :  { %v1495_v24 = vmul.f32 -1.442695, %v607_v23 }
 0xd10   :  { %1626 = vpow2.f32 %v1495_v24 }
 0xd11   :  { %v604_v26 = vpop.f32.mrf.mxu3 }
 0xd16   :  { %v1627_v28 = vpop.eup %1626 }
 0xd17   :  { %v611_v29 = vadd.f32 1.0, %v1627_v28 }
 0xd19   :  { %1628 = vrcp.f32 %v611_v29  ;;  %v623_v33 = vand.u32 2147483648, %v611_v29  ;;  %v621_v35 = vand.u32 2147483647, %v611_v29  ;;  %vm617_vm4 = vweird.f32 %v611_v29 }
 0xd1b   :  { %v624_v37 = vor.u32 1.1754944e-38, %v623_v33  ;;  %vm622_vm7 = vcmp.eq.f32.partialorder %v621_v35, 8.507059e+37 }
 0xd1f   :  { %v1629_v30 = vpop.eup %1628 }
 0xd20   :  { %v613_v31 = vmul.f32 %v1629_v30, %v611_v29  ;;  %vm618_vm3 = vweird.f32 %v1629_v30 }
 0xd21   :  { %vm619_vm6 = vmor %vm617_vm4, %vm618_vm3 }
 0xd22   :  { %v614_v32 = vsub.f32 1.0, %v613_v31 }
 0xd24   :  { %v615_v34 = vmul.f32 %v1629_v30, %v614_v32 }
 0xd26   :  { %v616_v36 = vadd.f32 %v1629_v30, %v615_v34 }
 0xd28   :  { %v620_v38 = vsel %vm619_vm6, %v1629_v30, %v616_v36 }
 0xd29   :  { %v625_v40 = vsel %vm622_vm7, %v624_v37, %v620_v38 }
 0xd2a   :  { %v627_v41 = vmul.f32 2.0, %v625_v40 }
 0xd2c   :  { %v1496_v42 = vadd.f32 -1.0, %v627_v41 }
 0xd2e   :  { %v629_v43 = vsel %vm1907_vm5, %v1496_v42, %v625_v40 }
 0xd2f   :  { %632 = vrot.lane.b32.xlu2 %v629_v43, %s1770_s17  ;;  %v630_v50 = vmul.f32 %v629_v43, %v574_v9  ;;  %v2052_v9 = vld [vmem:[%s2217_s6] ss:$0 sm:$0xff] }
 0xd37   :  { %109 = vperm.xlu2 %1592, %v86_v44  }
 0xd3f   :  { %384 = vrot.lane.b32.xlu2 %v1943_v27, %s1777_s23 }
 0xd89   :  { %v633_v45 = vpop.permute.xlu2 %632 }
 0xd8a   :  { %v635_v46 = vmul.f32 %v633_v45, %v629_v43 }
 0xd8c   :  { %637 = vrot.lane.b32.xlu0 %v635_v46, %s1777_s23 }
 0xd91   :  { %v110_v47 = vpop.permute.xlu2 %109 }
 0xd92   :  { %vm120_vm8 = vcmp.eq.s32.totalorder %v1895_v15, %v110_v47 }
 0xd94   :  { %112 = vperm.xlu0 %1590, %v87_v48  }
 0xd99   :  { %v385_v49 = vpop.permute.xlu2 %384 }
 0xd9a   :  { %387 = vst.msk [vmem:[#allocation2 + $0x8] sm:$0xff] %vm259_vm10, %v385_v49 }
 0xdfe   :  { %v638_v52 = vpop.permute.xlu0 %637 }
 0xdff   :  { %v2015_v53 = vadd.f32 %v638_v52, %v630_v50 }
 0xe01   :  { %1630 = vtanh.f32 %v2015_v53 }
 0xe06   :  { %v113_v27 = vpop.permute.xlu0 %112 }
 0xe07   :  { %v1631_v54 = vpop.eup %1630  ;;  %vm121_vm9 = vcmp.eq.s32.totalorder %v1895_v15, %v113_v27 }
 0xe08   :  { %vm1470_vm11 = vmpackc.low %vm121_vm9, %vm120_vm8  ;;  %643 = vrot.lane.b32.xlu1 %v1631_v54, %s1770_s17 }
 0xe09   :  { %1471 = vmatmul.msk.bf16.gmra.mxu0 %vm1470_vm11, %v1775_v17  ;;  %v794_v17 = vld [vmem:[#allocation2 + $0x8] sm:$0xff] }
 0xe10   :  { %318 = vrot.lane.b32.xlu1 %v1922_v51, %s1777_s23  ;;  %v2031_v51 = vld [vmem:[#allocation7 + $0x8] sm:$0xff] }
 0xe11   :  { %879 = vmatpush.bf16.msrb.mxu1 %v2031_v51  ;;  %940 = vmatpush.bf16.msrb.mxu2 %v2031_v51 }
 0xe12   :  { %1245 = vmatpush.bf16.msrb.mxu0 %v2031_v51 }
 0xe15   :  { %880 = vmatpush.bf16.msrb.mxu1 %v2034_v63  ;;  %941 = vmatpush.bf16.msrb.mxu2 %v2034_v63 }
 0xe16   :  { %1246 = vmatpush.bf16.msrb.mxu0 %v2034_v63 }
 0xe7a   :  { %v644_v57 = vpop.permute.xlu1 %643 }
 0xe7b   :  { %v2024_v58 = vmul.f32 %v644_v57, %v629_v43 }
 0xe7d   :  { %v652_v59 = vpack.c.bf16 %v2024_v58, %v2024_v58 }
 0xe7f   :  { %654 = vrot.lane.b32.xlu0 %v652_v59, %s1777_s23 }
 0xe82   :  { %v319_v15 = vpop.permute.xlu1 %318 }
 0xe83   :  { %321 = vst.msk [vmem:[#allocation2] sm:$0xff] %vm259_vm10, %v319_v15 }
 0xe86   :  { %v242_v2 = vpop.f32.mrf.mxu0 }
 0xe87   :  { %v243_v3 = vadd.f32 %v1905_v20, %v242_v2 }
 0xe8a   :  { %v793_v60 = vld [vmem:[#allocation2] sm:$0xff] }
 0xe8b   :  { %v801_v61 = vpack.c.bf16 %v794_v17, %v793_v60 }
 0xe8d   :  { %1511 = vmatmul.msk.bf16.vlgmr.msra.gmra.mxu3 %vm259_vm10, %v801_v61 }
 0xef1   :  { %v655_v1 = vpop.permute.xlu0 %654 }
 0xef2   :  { %1497 = vmatmul.msk.bf16.vlgmr.msra.gmra.mxu1 %vm259_vm10, %v655_v1 }
 0xef3   :  { %1001 = vmatpush.bf16.msra.mxu1 %v2031_v51 }
 0xef7   :  { %1002 = vmatpush.bf16.msra.mxu1 %v2034_v63 }
 0xf02   :  { %881 = vmatmul.bf16.vlgmr.msrb.gmra.mxu1 %v1774_v0 }
 0xf03   :  { %1123 = vmatpush.bf16.msrb.mxu1 %v2031_v51 }
 0xf07   :  { %1124 = vmatpush.bf16.msrb.mxu1 %v2034_v63 }
 0xf10   :  { %v841_v0 = vpop.f32.mrf.mxu3 }
 0xf11   :  { %v842_v13 = vadd.f32 %v2052_v9, %v841_v0 }
 0xf6f   :  { %v668_v4 = vpop.f32.mrf.mxu1 }
 0xf70   :  { %v672_v5 = vadd.f32 %v668_v4, %v243_v3 }
 0xf72   :  { %v673_v6 = vmul.f32 %v672_v5, %v1914_v25 }
 0xf74   :  { %v1498_v7 = vmul.f32 -1.442695, %v673_v6 }
 0xf76   :  { %1632 = vpow2.f32 %v1498_v7 }
 0xf77   :  { %v670_v8 = vpop.f32.mrf.mxu1 }
 0xf7c   :  { %v1633_v10 = vpop.eup %1632 }
 0xf7d   :  { %v677_v11 = vadd.f32 1.0, %v1633_v10 }
 0xf7f   :  { %1634 = vrcp.f32 %v677_v11  ;;  %v882_v14 = vpop.f32.mrf.mxu1  ;;  %v689_v26 = vand.u32 2147483648, %v677_v11  ;;  %v687_v29 = vand.u32 2147483647, %v677_v11  ;;  %vm683_vm13 = vweird.f32 %v677_v11 }
 0xf80   :  { %v886_v20 = vadd.f32 %v882_v14, %v842_v13  ;;  %v843_v14 = vpop.f32.mrf.mxu3 }
 0xf81   :  { %v690_v33 = vor.u32 1.1754944e-38, %v689_v26  ;;  %vm688_vm15 = vcmp.eq.f32.partialorder %v687_v29, 8.507059e+37 }
 0xf82   :  { %v887_v16 = vmul.f32 %v886_v20, %v1914_v25  ;;  %v844_v20 = vadd.f32 %v2052_v9, %v843_v14 }
 0xf84   :  { %v1523_v18 = vmul.f32 -1.442695, %v887_v16 }
 0xf85   :  { %v1635_v19 = vpop.eup %1634 }
 0xf86   :  { %1636 = vpow2.f32 %v1523_v18  ;;  %v679_v22 = vmul.f32 %v1635_v19, %v677_v11  ;;  %vm684_vm12 = vweird.f32 %v1635_v19 }
 0xf87   :  { %v884_v23 = vpop.f32.mrf.mxu1  ;;  %vm685_vm14 = vmor %vm683_vm13, %vm684_vm12 }
 0xf88   :  { %v680_v24 = vsub.f32 1.0, %v679_v22 }
 0xf8a   :  { %v681_v28 = vmul.f32 %v1635_v19, %v680_v24 }
 0xf8c   :  { %v1637_v30 = vpop.eup %1636  ;;  %v682_v31 = vadd.f32 %v1635_v19, %v681_v28 }
 0xf8d   :  { %v891_v32 = vadd.f32 1.0, %v1637_v30 }
 0xf8e   :  { %v686_v34 = vsel %vm685_vm14, %v1635_v19, %v682_v31 }
 0xf8f   :  { %1638 = vrcp.f32 %v891_v32  ;;  %v691_v35 = vsel %vm688_vm15, %v690_v33, %v686_v34  ;;  %v903_v43 = vand.u32 2147483648, %v891_v32  ;;  %v901_v45 = vand.u32 2147483647, %v891_v32 }
 0xf90   :  { %v693_v36 = vmul.f32 2.0, %v691_v35  ;;  %vm897_vm1 = vweird.f32 %v891_v32 }
 0xf91   :  { %v904_v47 = vor.u32 1.1754944e-38, %v903_v43  ;;  %vm902_vm3 = vcmp.eq.f32.partialorder %v901_v45, 8.507059e+37 }
 0xf92   :  { %v1499_v37 = vadd.f32 -1.0, %v693_v36 }
 0xf94   :  { %v695_v38 = vsel %vm1907_vm5, %v1499_v37, %v691_v35 }
 0xf95   :  { %v1639_v40 = vpop.eup %1638  ;;  %698 = vrot.lane.b32.xlu1 %v695_v38, %s1770_s17  ;;  %v696_v17 = vmul.f32 %v695_v38, %v2015_v53 }
 0xf96   :  { %v893_v41 = vmul.f32 %v1639_v40, %v891_v32  ;;  %vm898_vm0 = vweird.f32 %v1639_v40 }
 0xf97   :  { %vm899_vm2 = vmor %vm897_vm1, %vm898_vm0 }
 0xf98   :  { %v894_v42 = vsub.f32 1.0, %v893_v41 }
 0xf9a   :  { %v895_v44 = vmul.f32 %v1639_v40, %v894_v42 }
 0xf9c   :  { %v896_v46 = vadd.f32 %v1639_v40, %v895_v44 }
 0xf9e   :  { %v900_v48 = vsel %vm899_vm2, %v1639_v40, %v896_v46 }
 0xf9f   :  { %v905_v49 = vsel %vm902_vm3, %v904_v47, %v900_v48 }
 0xfa0   :  { %v907_v50 = vmul.f32 2.0, %v905_v49 }
 0xfa2   :  { %v1524_v52 = vadd.f32 -1.0, %v907_v50 }
 0xfa4   :  { %v909_v27 = vsel %vm1907_vm5, %v1524_v52, %v905_v49 }
 0xfa5   :  { %912 = vrot.lane.b32.xlu2 %v909_v27, %s1770_s17  ;;  %v910_v59 = vmul.f32 0.0, %v909_v27 }
 0xfff   :  { %v913_v54 = vpop.permute.xlu2 %912 }
0x1000   :  { %v915_v55 = vmul.f32 %v913_v54, %v909_v27 }
0x1002   :  { %917 = vrot.lane.b32.xlu1 %v915_v55, %s1777_s23 }
0x1007   :  { %v699_v56 = vpop.permute.xlu1 %698 }
0x1008   :  { %v701_v57 = vmul.f32 %v699_v56, %v695_v38 }
0x100a   :  { %703 = vrot.lane.b32.xlu0 %v701_v57, %s1777_s23 }
0x1074   :  { %v918_v15 = vpop.permute.xlu1 %917 }
0x1075   :  { %v2064_v60 = vadd.f32 %v918_v15, %v910_v59 }
0x1077   :  { %1640 = vtanh.f32 %v2064_v60 }
0x107c   :  { %v704_v61 = vpop.permute.xlu0 %703 }
0x107d   :  { %v1641_v1 = vpop.eup %1640  ;;  %v2068_v2 = vadd.f32 %v704_v61, %v696_v17 }
0x107e   :  { %923 = vrot.lane.b32.xlu0 %v1641_v1, %s1770_s17 }
0x107f   :  { %1642 = vtanh.f32 %v2068_v2 }
0x1085   :  { %v1643_v3 = vpop.eup %1642 }
0x1086   :  { %709 = vrot.lane.b32.xlu2 %v1643_v3, %s1770_s17 }
0x10e0   :  { %v710_v4 = vpop.permute.xlu2 %709 }
0x10e1   :  { %v2073_v5 = vmul.f32 %v710_v4, %v695_v38 }
0x10e3   :  { %v718_v6 = vpack.c.bf16 %v2073_v5, %v2073_v5 }
0x10e5   :  { %720 = vrot.lane.b32.xlu1 %v718_v6, %s1777_s23 }
0x10f0   :  { %v924_v53 = vpop.permute.xlu0 %923 }
0x10f1   :  { %v926_v7 = vmul.f32 %v924_v53, %v909_v27 }
0x10f3   :  { %v927_v8 = vpack.c.bf16 %v926_v7, %v926_v7 }
0x10f5   :  { %929 = vrot.lane.b32.xlu2 %v927_v8, %s1777_s23 }
0x114f   :  { %v930_v10 = vpop.permute.xlu2 %929 }
0x1157   :  { %v721_v0 = vpop.permute.xlu1 %720 }
0x1158   :  { %1500 = vmatmul.msk.bf16.vlgmr.msra.gmra.mxu2 %vm259_vm10, %v721_v0 }
0x1159   :  { %1062 = vmatpush.bf16.msra.mxu2 %v2031_v51 }
0x115d   :  { %1063 = vmatpush.bf16.msra.mxu2 %v2034_v63 }
0x1168   :  { %1525 = vmatmul.msk.bf16.vlgmr.msrb.gmra.mxu2 %vm259_vm10, %v930_v10 }
0x1169   :  { %1184 = vmatpush.bf16.msrb.mxu2 %v2031_v51 }
0x116d   :  { %1185 = vmatpush.bf16.msrb.mxu2 %v2034_v63 }
0x11db   :  { %v2085_v11 = vpop.f32.mrf.mxu2 }
0x11e3   :  { %v736_v13 = vpop.f32.mrf.mxu2 }
0x11eb   :  { %v943_v16 = vpop.f32.mrf.mxu2 }
0x11ec   :  { %v947_v18 = vadd.f32 %v943_v16, %v844_v20 }
0x11ee   :  { %v948_v19 = vmul.f32 %v947_v18, %v1914_v25 }
0x11f0   :  { %v1526_v22 = vmul.f32 -1.442695, %v948_v19 }
0x11f2   :  { %1644 = vpow2.f32 %v1526_v22 }
0x11f3   :  { %v945_v23 = vpop.f32.mrf.mxu2 }
0x11f8   :  { %v1645_v24 = vpop.eup %1644 }
0x11f9   :  { %v952_v26 = vadd.f32 1.0, %v1645_v24 }
0x11fb   :  { %1646 = vrcp.f32 %v952_v26  ;;  %v964_v31 = vand.u32 2147483648, %v952_v26  ;;  %v962_v33 = vand.u32 2147483647, %v952_v26  ;;  %vm958_vm6 = vweird.f32 %v952_v26 }
0x11fd   :  { %v965_v35 = vor.u32 1.1754944e-38, %v964_v31  ;;  %vm963_vm8 = vcmp.eq.f32.partialorder %v962_v33, 8.507059e+37 }
0x1201   :  { %v1647_v28 = vpop.eup %1646 }
0x1202   :  { %v954_v29 = vmul.f32 %v1647_v28, %v952_v26  ;;  %vm959_vm4 = vweird.f32 %v1647_v28 }
0x1203   :  { %vm960_vm7 = vmor %vm958_vm6, %vm959_vm4 }
0x1204   :  { %v955_v30 = vsub.f32 1.0, %v954_v29 }
0x1206   :  { %v956_v32 = vmul.f32 %v1647_v28, %v955_v30 }
0x1208   :  { %v957_v34 = vadd.f32 %v1647_v28, %v956_v32 }
0x120a   :  { %v961_v36 = vsel %vm960_vm7, %v1647_v28, %v957_v34 }
0x120b   :  { %v966_v37 = vsel %vm963_vm8, %v965_v35, %v961_v36 }
0x120c   :  { %v968_v38 = vmul.f32 2.0, %v966_v37 }
0x120e   :  { %v1527_v40 = vadd.f32 -1.0, %v968_v38 }
0x1210   :  { %v970_v41 = vsel %vm1907_vm5, %v1527_v40, %v966_v37 }
0x1211   :  { %973 = vrot.lane.b32.xlu0 %v970_v41, %s1770_s17  ;;  %v971_v45 = vmul.f32 %v970_v41, %v2064_v60 }
0x1219   :  { %450 = vrot.lane.b32.xlu0 %v1959_v62, %s1777_s23 }
0x1283   :  { %v974_v42 = vpop.permute.xlu0 %973 }
0x1284   :  { %v976_v43 = vmul.f32 %v974_v42, %v970_v41 }
0x1286   :  { %978 = vrot.lane.b32.xlu1 %v976_v43, %s1777_s23 }
0x128b   :  { %v451_v44 = vpop.permute.xlu0 %450 }
0x128c   :  { %453 = vst.msk [vmem:[#allocation2 + $0x10] sm:$0xff] %vm259_vm10, %v451_v44 }
0x128e   :  { %516 = vrot.lane.b32.xlu1 %v1978_v39, %s1777_s23 }
0x1293   :  { %v795_v62 = vld [vmem:[#allocation2 + $0x10] sm:$0xff] }
0x12f8   :  { %v979_v46 = vpop.permute.xlu1 %978 }
0x12f9   :  { %v981_v47 = vadd.f32 %v979_v46, %v971_v45 }
0x12fb   :  { %1648 = vtanh.f32 %v981_v47 }
0x1300   :  { %v517_v48 = vpop.permute.xlu1 %516 }
0x1301   :  { %v1649_v49 = vpop.eup %1648  ;;  %519 = vst.msk [vmem:[#allocation2 + $0x18] sm:$0xff] %vm259_vm10, %v517_v48 }
0x1302   :  { %984 = vrot.lane.b32.xlu2 %v1649_v49, %s1770_s17 }
0x1308   :  { %v796_v50 = vld [vmem:[#allocation2 + $0x18] sm:$0xff] }
0x1309   :  { %v802_v52 = vpack.c.bf16 %v796_v50, %v795_v62 }
0x130b   :  { %1512 = vmatmul.msk.bf16.gmra.mxu3 %vm259_vm10, %v802_v52 }
0x135c   :  { %v985_v27 = vpop.permute.xlu2 %984 }
0x135d   :  { %v987_v54 = vmul.f32 %v985_v27, %v970_v41 }
0x135f   :  { %v988_v55 = vpack.c.bf16 %v987_v54, %v987_v54 }
0x1361   :  { %990 = vrot.lane.b32.xlu2 %v988_v55, %s1777_s23 }
0x138e   :  { %v846_v56 = vpop.f32.mrf.mxu3 }
0x138f   :  { %v847_v57 = vadd.f32 %v2052_v9, %v846_v56 }
0x1396   :  { %v848_v32 = vpop.f32.mrf.mxu3 }
0x1397   :  { %v849_v33 = vadd.f32 %v2052_v9, %v848_v32 }
0x13bb   :  { %v991_v39 = vpop.permute.xlu2 %990 }
0x13bc   :  { %1528 = vmatmul.msk.bf16.vlgmr.msra.gmra.mxu1 %vm259_vm10, %v991_v39 }
0x13bd   :  { %1306 = vmatpush.bf16.msra.mxu1 %v2031_v51 }
0x13c1   :  { %1307 = vmatpush.bf16.msra.mxu1 %v2034_v63 }
0x1439   :  { %v1004_v59 = vpop.f32.mrf.mxu1 }
0x143a   :  { %v1008_v15 = vadd.f32 %v1004_v59, %v847_v57 }
0x143c   :  { %v1009_v60 = vmul.f32 %v1008_v15, %v1914_v25 }
0x143e   :  { %v1529_v17 = vmul.f32 -1.442695, %v1009_v60 }
0x1440   :  { %1650 = vpow2.f32 %v1529_v17 }
0x1441   :  { %v1006_v61 = vpop.f32.mrf.mxu1 }
0x1446   :  { %v1651_v1 = vpop.eup %1650 }
0x1447   :  { %v1013_v3 = vadd.f32 1.0, %v1651_v1 }
0x1449   :  { %1652 = vrcp.f32 %v1013_v3  ;;  %v1025_v7 = vand.u32 2147483648, %v1013_v3  ;;  %v1023_v63 = vand.u32 2147483647, %v1013_v3  ;;  %vm1019_vm11 = vweird.f32 %v1013_v3 }
0x144b   :  { %v1026_v0 = vor.u32 1.1754944e-38, %v1025_v7  ;;  %vm1024_vm13 = vcmp.eq.f32.partialorder %v1023_v63, 8.507059e+37 }
0x144f   :  { %v1653_v4 = vpop.eup %1652 }
0x1450   :  { %v1015_v6 = vmul.f32 %v1653_v4, %v1013_v3  ;;  %vm1020_vm9 = vweird.f32 %v1653_v4 }
0x1451   :  { %vm1021_vm12 = vmor %vm1019_vm11, %vm1020_vm9 }
0x1452   :  { %v1016_v53 = vsub.f32 1.0, %v1015_v6 }
0x1454   :  { %v1017_v51 = vmul.f32 %v1653_v4, %v1016_v53 }
0x1456   :  { %v1018_v8 = vadd.f32 %v1653_v4, %v1017_v51 }
0x1458   :  { %v1022_v10 = vsel %vm1021_vm12, %v1653_v4, %v1018_v8 }
0x1459   :  { %v1027_v13 = vsel %vm1024_vm13, %v1026_v0, %v1022_v10 }
0x145a   :  { %v1029_v14 = vmul.f32 2.0, %v1027_v13 }
0x145c   :  { %v1530_v20 = vadd.f32 -1.0, %v1029_v14 }
0x145e   :  { %v1031_v16 = vsel %vm1907_vm5, %v1530_v20, %v1027_v13 }
0x145f   :  { %1034 = vrot.lane.b32.xlu0 %v1031_v16, %s1770_s17  ;;  %v1032_v22 = vmul.f32 %v1031_v16, %v981_v47 }
0x14d1   :  { %v1035_v18 = vpop.permute.xlu0 %1034 }
0x14d2   :  { %v1037_v19 = vmul.f32 %v1035_v18, %v1031_v16 }
0x14d4   :  { %1039 = vrot.lane.b32.xlu1 %v1037_v19, %s1777_s23 }
0x1546   :  { %v1040_v23 = vpop.permute.xlu1 %1039 }
0x1547   :  { %v1042_v24 = vadd.f32 %v1040_v23, %v1032_v22 }
0x1549   :  { %1654 = vtanh.f32 %v1042_v24 }
0x154f   :  { %v1655_v26 = vpop.eup %1654 }
0x1550   :  { %1045 = vrot.lane.b32.xlu2 %v1655_v26, %s1770_s17 }
0x15aa   :  { %v1046_v28 = vpop.permute.xlu2 %1045 }
0x15ab   :  { %v1048_v29 = vmul.f32 %v1046_v28, %v1031_v16 }
0x15ad   :  { %v1049_v30 = vpack.c.bf16 %v1048_v29, %v1048_v29 }
0x15af   :  { %1051 = vrot.lane.b32.xlu0 %v1049_v30, %s1777_s23 }
0x1621   :  { %v1052_v31 = vpop.permute.xlu0 %1051 }
0x1622   :  { %1531 = vmatmul.msk.bf16.vlgmr.msra.gmra.mxu2 %vm259_vm10, %v1052_v31 }
0x1623   :  { %1407 = vmatpush.bf16.msra.mxu2 %v1580_v21 }
0x16a5   :  { %v1065_v34 = vpop.f32.mrf.mxu2 }
0x16a6   :  { %v1069_v35 = vadd.f32 %v1065_v34, %v849_v33  ;;  %v244_v33 = vpop.f32.mrf.mxu0  ;;  %v1692_v34 = vld [vmem:[%s2214_s3] ss:$0 sm:$0xff] }
0x16a8   :  { %v1070_v36 = vmul.f32 %v1069_v35, %v1914_v25  ;;  %v245_v35 = vadd.f32 %v1692_v34, %v244_v33 }
0x16aa   :  { %v1532_v37 = vmul.f32 -1.442695, %v1070_v36  ;;  %v738_v36 = vadd.f32 %v2085_v11, %v245_v35 }
0x16ac   :  { %1656 = vpow2.f32 %v1532_v37  ;;  %v739_v37 = vmul.f32 %v738_v36, %v1914_v25 }
0x16ad   :  { %v1067_v38 = vpop.f32.mrf.mxu2 }
0x16ae   :  { %v1501_v38 = vmul.f32 -1.442695, %v739_v37 }
0x16b2   :  { %v1657_v40 = vpop.eup %1656 }
0x16b3   :  { %v1074_v41 = vadd.f32 1.0, %v1657_v40 }
0x16b5   :  { %1658 = vrcp.f32 %v1074_v41  ;;  %v1086_v45 = vand.u32 2147483648, %v1074_v41  ;;  %v1084_v47 = vand.u32 2147483647, %v1074_v41  ;;  %vm1080_vm15 = vweird.f32 %v1074_v41 }
0x16b7   :  { %v1087_v49 = vor.u32 1.1754944e-38, %v1086_v45  ;;  %vm1085_vm1 = vcmp.eq.f32.partialorder %v1084_v47, 8.507059e+37 }
0x16bb   :  { %v1659_v42 = vpop.eup %1658 }
0x16bc   :  { %v1076_v43 = vmul.f32 %v1659_v42, %v1074_v41  ;;  %vm1081_vm14 = vweird.f32 %v1659_v42 }
0x16bd   :  { %vm1082_vm0 = vmor %vm1080_vm15, %vm1081_vm14 }
0x16be   :  { %v1077_v44 = vsub.f32 1.0, %v1076_v43 }
0x16c0   :  { %v1078_v46 = vmul.f32 %v1659_v42, %v1077_v44 }
0x16c2   :  { %v1079_v48 = vadd.f32 %v1659_v42, %v1078_v46 }
0x16c4   :  { %v1083_v62 = vsel %vm1082_vm0, %v1659_v42, %v1079_v48 }
0x16c5   :  { %v1088_v50 = vsel %vm1085_vm1, %v1087_v49, %v1083_v62 }
0x16c6   :  { %v1090_v52 = vmul.f32 2.0, %v1088_v50 }
0x16c8   :  { %v1533_v27 = vadd.f32 -1.0, %v1090_v52 }
0x16ca   :  { %v1092_v54 = vsel %vm1907_vm5, %v1533_v27, %v1088_v50 }
0x16cb   :  { %1095 = vrot.lane.b32.xlu1 %v1092_v54, %s1770_s17  ;;  %v1093_v57 = vmul.f32 %v1092_v54, %v1042_v24 }
0x16d3   :  { %582 = vrot.lane.b32.xlu1 %v1994_v12, %s1777_s23 }
0x173d   :  { %v1096_v55 = vpop.permute.xlu1 %1095 }
0x173e   :  { %v1098_v39 = vmul.f32 %v1096_v55, %v1092_v54 }
0x1740   :  { %1100 = vrot.lane.b32.xlu2 %v1098_v39, %s1777_s23 }
0x1745   :  { %v583_v56 = vpop.permute.xlu1 %582 }
0x1746   :  { %585 = vst.msk [vmem:[#allocation2 + $0x20] sm:$0xff] %vm259_vm10, %v583_v56 }
0x1748   :  { %648 = vrot.lane.b32.xlu2 %v2024_v58, %s1777_s23 }
0x174d   :  { %v797_v12 = vld [vmem:[#allocation2 + $0x20] sm:$0xff] }
0x179a   :  { %v1101_v59 = vpop.permute.xlu2 %1100 }
0x179b   :  { %v2126_v15 = vadd.f32 %v1101_v59, %v1093_v57 }
0x179d   :  { %1660 = vtanh.f32 %v2126_v15 }
0x17a2   :  { %v649_v60 = vpop.permute.xlu2 %648 }
0x17a3   :  { %v1661_v17 = vpop.eup %1660  ;;  %651 = vst.msk [vmem:[#allocation2 + $0x28] sm:$0xff] %vm259_vm10, %v649_v60 }
0x17a4   :  { %1106 = vrot.lane.b32.xlu0 %v1661_v17, %s1770_s17 }
0x17aa   :  { %v798_v61 = vld [vmem:[#allocation2 + $0x28] sm:$0xff] }
0x17ab   :  { %v803_v1 = vpack.c.bf16 %v798_v61, %v797_v12 }
0x17ad   :  { %1513 = vmatmul.msk.bf16.gmra.mxu3 %vm259_vm10, %v803_v1 }
0x1816   :  { %v1107_v3 = vpop.permute.xlu0 %1106 }
0x1817   :  { %v1109_v4 = vmul.f32 %v1107_v3, %v1092_v54 }
0x1819   :  { %v1110_v58 = vpack.c.bf16 %v1109_v4, %v1109_v4 }
0x181b   :  { %1112 = vrot.lane.b32.xlu0 %v1110_v58, %s1777_s23 }
0x1830   :  { %v851_v53 = vpop.f32.mrf.mxu3 }
0x1831   :  { %v852_v7 = vadd.f32 %v2052_v9, %v851_v53 }
0x1838   :  { %v853_v4 = vpop.f32.mrf.mxu3 }
0x188d   :  { %v1113_v6 = vpop.permute.xlu0 %1112 }
0x188e   :  { %1534 = vmatmul.msk.bf16.vlgmr.msrb.gmra.mxu1 %vm259_vm10, %v1113_v6 }
0x190b   :  { %v1126_v51 = vpop.f32.mrf.mxu1 }
0x190c   :  { %v1130_v63 = vadd.f32 %v1126_v51, %v852_v7 }
0x190e   :  { %v1131_v8 = vmul.f32 %v1130_v63, %v1914_v25 }
0x1910   :  { %v1535_v0 = vmul.f32 -1.442695, %v1131_v8 }
0x1912   :  { %1662 = vpow2.f32 %v1535_v0 }
0x1913   :  { %v1128_v10 = vpop.f32.mrf.mxu1 }
0x1918   :  { %v1663_v13 = vpop.eup %1662 }
0x1919   :  { %v1135_v14 = vadd.f32 1.0, %v1663_v13 }
0x191b   :  { %1664 = vrcp.f32 %v1135_v14  ;;  %v1147_v19 = vand.u32 2147483648, %v1135_v14  ;;  %v1145_v23 = vand.u32 2147483647, %v1135_v14  ;;  %vm1141_vm3 = vweird.f32 %v1135_v14 }
0x191c   :  { %1666 = vpow2.f32 %v1501_v38 }
0x191d   :  { %v1148_v26 = vor.u32 1.1754944e-38, %v1147_v19  ;;  %vm1146_vm6 = vcmp.eq.f32.partialorder %v1145_v23, 8.507059e+37 }
0x1921   :  { %v1665_v20 = vpop.eup %1664 }
0x1922   :  { %v1137_v16 = vmul.f32 %v1665_v20, %v1135_v14  ;;  %vm1142_vm2 = vweird.f32 %v1665_v20  ;;  %v1667_v40 = vpop.eup %1666 }
0x1923   :  { %vm1143_vm4 = vmor %vm1141_vm3, %vm1142_vm2  ;;  %v743_v41 = vadd.f32 1.0, %v1667_v40 }
0x1924   :  { %v1138_v18 = vsub.f32 1.0, %v1137_v16 }
0x1925   :  { %1668 = vrcp.f32 %v743_v41  ;;  %v755_v47 = vand.u32 2147483648, %v743_v41  ;;  %vm749_vm8 = vweird.f32 %v743_v41  ;;  %v753_v48 = vand.u32 2147483647, %v743_v41 }
0x1926   :  { %v1139_v22 = vmul.f32 %v1665_v20, %v1138_v18 }
0x1927   :  { %v756_v62 = vor.u32 1.1754944e-38, %v755_v47  ;;  %vm754_vm11 = vcmp.eq.f32.partialorder %v753_v48, 8.507059e+37 }
0x1928   :  { %v1140_v24 = vadd.f32 %v1665_v20, %v1139_v22 }
0x192a   :  { %v1144_v28 = vsel %vm1143_vm4, %v1665_v20, %v1140_v24 }
0x192b   :  { %v1149_v29 = vsel %vm1146_vm6, %v1148_v26, %v1144_v28  ;;  %v1669_v42 = vpop.eup %1668 }
0x192c   :  { %v1151_v30 = vmul.f32 2.0, %v1149_v29  ;;  %v745_v43 = vmul.f32 %v1669_v42, %v743_v41  ;;  %vm750_vm7 = vweird.f32 %v1669_v42 }
0x192d   :  { %vm751_vm9 = vmor %vm749_vm8, %vm750_vm7 }
0x192e   :  { %v1536_v31 = vadd.f32 -1.0, %v1151_v30  ;;  %v746_v44 = vsub.f32 1.0, %v745_v43 }
0x1930   :  { %v1153_v32 = vsel %vm1907_vm5, %v1536_v31, %v1149_v29  ;;  %v747_v45 = vmul.f32 %v1669_v42, %v746_v44 }
0x1931   :  { %1156 = vrot.lane.b32.xlu1 %v1153_v32, %s1770_s17  ;;  %v1154_v39 = vmul.f32 %v1153_v32, %v2126_v15  ;;  %v854_v15 = vadd.f32 %v2052_v9, %v853_v4 }
0x1932   :  { %v748_v46 = vadd.f32 %v1669_v42, %v747_v45 }
0x1934   :  { %v752_v49 = vsel %vm751_vm9, %v1669_v42, %v748_v46 }
0x1935   :  { %v757_v11 = vsel %vm754_vm11, %v756_v62, %v752_v49 }
0x1936   :  { %v759_v27 = vmul.f32 2.0, %v757_v11 }
0x1938   :  { %v1502_v54 = vadd.f32 -1.0, %v759_v27 }
0x193a   :  { %v761_v55 = vsel %vm1907_vm5, %v1502_v54, %v757_v11 }
0x193b   :  { %v762_v26 = vmul.f32 %v761_v55, %v2068_v2 }
0x19a3   :  { %v1157_v50 = vpop.permute.xlu1 %1156 }
0x19a4   :  { %v1159_v52 = vmul.f32 %v1157_v50, %v1153_v32 }
0x19a6   :  { %1161 = vrot.lane.b32.xlu2 %v1159_v52, %s1777_s23 }
0x19ae   :  { %764 = vrot.lane.b32.xlu2 %v761_v55, %s1770_s17 }
0x1a00   :  { %v1162_v56 = vpop.permute.xlu2 %1161 }
0x1a01   :  { %v1164_v57 = vadd.f32 %v1162_v56, %v1154_v39 }
0x1a03   :  { %1670 = vtanh.f32 %v1164_v57 }
0x1a08   :  { %v765_v61 = vpop.permute.xlu2 %764 }
0x1a09   :  { %v1671_v59 = vpop.eup %1670  ;;  %v767_v1 = vmul.f32 %v765_v61, %v761_v55 }
0x1a0a   :  { %1167 = vrot.lane.b32.xlu0 %v1671_v59, %s1770_s17 }
0x1a7c   :  { %v1168_v60 = vpop.permute.xlu0 %1167 }
0x1a7d   :  { %v1170_v17 = vmul.f32 %v1168_v60, %v1153_v32 }
0x1a7f   :  { %v1171_v12 = vpack.c.bf16 %v1170_v17, %v1170_v17 }
0x1a81   :  { %1173 = vrot.lane.b32.xlu1 %v1171_v12, %s1777_s23 }
0x1a89   :  { %769 = vrot.lane.b32.xlu1 %v767_v1, %s1777_s23 }
0x1af3   :  { %v1174_v3 = vpop.permute.xlu1 %1173 }
0x1af4   :  { %1537 = vmatmul.msk.bf16.vlgmr.msrb.gmra.mxu2 %vm259_vm10, %v1174_v3 }
0x1afb   :  { %v770_v23 = vpop.permute.xlu1 %769 }
0x1afc   :  { %v772_v29 = vadd.f32 %v770_v23, %v762_v26 }
0x1b77   :  { %v1187_v58 = vpop.f32.mrf.mxu2 }
0x1b78   :  { %v1191_v6 = vadd.f32 %v1187_v58, %v854_v15 }
0x1b7a   :  { %v1192_v53 = vmul.f32 %v1191_v6, %v1914_v25 }
0x1b7c   :  { %v1538_v7 = vmul.f32 -1.442695, %v1192_v53 }
0x1b7e   :  { %1672 = vpow2.f32 %v1538_v7 }
0x1b7f   :  { %v1189_v51 = vpop.f32.mrf.mxu2 }
0x1b84   :  { %v1673_v63 = vpop.eup %1672 }
0x1b85   :  { %v1196_v8 = vadd.f32 1.0, %v1673_v63 }
0x1b87   :  { %1674 = vrcp.f32 %v1196_v8  ;;  %v1208_v14 = vand.u32 2147483648, %v1196_v8  ;;  %v1206_v16 = vand.u32 2147483647, %v1196_v8  ;;  %vm1202_vm13 = vweird.f32 %v1196_v8 }
0x1b88   :  { %1676 = vtanh.f32 %v772_v29 }
0x1b89   :  { %v1209_v19 = vor.u32 1.1754944e-38, %v1208_v14  ;;  %vm1207_vm15 = vcmp.eq.f32.partialorder %v1206_v16, 8.507059e+37 }
0x1b8d   :  { %v1675_v0 = vpop.eup %1674 }
0x1b8e   :  { %v1198_v10 = vmul.f32 %v1675_v0, %v1196_v8  ;;  %vm1203_vm12 = vweird.f32 %v1675_v0  ;;  %v1677_v32 = vpop.eup %1676 }
0x1b8f   :  { %vm1204_vm14 = vmor %vm1202_vm13, %vm1203_vm12 }
0x1b90   :  { %v1199_v13 = vsub.f32 1.0, %v1198_v10 }
0x1b92   :  { %v1200_v20 = vmul.f32 %v1675_v0, %v1199_v13 }
0x1b94   :  { %v1201_v18 = vadd.f32 %v1675_v0, %v1200_v20 }
0x1b96   :  { %v1205_v22 = vsel %vm1204_vm14, %v1675_v0, %v1201_v18 }
0x1b97   :  { %v1210_v24 = vsel %vm1207_vm15, %v1209_v19, %v1205_v22 }
0x1b98   :  { %v1212_v28 = vmul.f32 2.0, %v1210_v24 }
0x1b9a   :  { %v1539_v30 = vadd.f32 -1.0, %v1212_v28 }
0x1b9c   :  { %v1214_v31 = vsel %vm1907_vm5, %v1539_v30, %v1210_v24 }
0x1b9d   :  { %1217 = vrot.lane.b32.xlu0 %v1214_v31, %s1770_s17  ;;  %v1215_v2 = vmul.f32 %v1214_v31, %v1164_v57 }
0x1ba5   :  { %775 = vrot.lane.b32.xlu0 %v1677_v32, %s1770_s17 }
0x1c0f   :  { %v1218_v33 = vpop.permute.xlu0 %1217 }
0x1c10   :  { %v1220_v34 = vmul.f32 %v1218_v33, %v1214_v31 }
0x1c12   :  { %1222 = vrot.lane.b32.xlu2 %v1220_v34, %s1777_s23 }
0x1c17   :  { %v776_v35 = vpop.permute.xlu0 %775 }
0x1c18   :  { %v2161_v36 = vmul.f32 %v776_v35, %v761_v55 }
0x1c1a   :  { %714 = vrot.lane.b32.xlu2 %v2073_v5, %s1777_s23  ;;  %780 = vrot.lane.b32.xlu0 %v2161_v36, %s1777_s23 }
0x1c6c   :  { %v1223_v37 = vpop.permute.xlu2 %1222 }
0x1c6d   :  { %v1225_v38 = vadd.f32 %v1223_v37, %v1215_v2 }
0x1c6f   :  { %1678 = vtanh.f32 %v1225_v38 }
0x1c74   :  { %v715_v40 = vpop.permute.xlu2 %714 }
0x1c75   :  { %v1679_v41 = vpop.eup %1678  ;;  %717 = vst.msk [vmem:[#allocation2 + $0x30] sm:$0xff] %vm259_vm10, %v715_v40 }
0x1c76   :  { %1228 = vrot.lane.b32.xlu1 %v1679_v41, %s1770_s17 }
0x1c7c   :  { %v799_v43 = vld [vmem:[#allocation2 + $0x30] sm:$0xff] }
0x1c8c   :  { %v781_v42 = vpop.permute.xlu0 %780 }
0x1c8d   :  { %783 = vst.msk [vmem:[#allocation2 + $0x38] sm:$0xff] %vm259_vm10, %v781_v42 }
0x1c94   :  { %v800_v44 = vld [vmem:[#allocation2 + $0x38] sm:$0xff] }
0x1c95   :  { %v804_v45 = vpack.c.bf16 %v800_v44, %v799_v43 }
0x1c97   :  { %1514 = vmatmul.msk.bf16.gmra.mxu3 %vm259_vm10, %v804_v45 }
0x1ce8   :  { %v1229_v5 = vpop.permute.xlu1 %1228 }
0x1ce9   :  { %v1231_v46 = vmul.f32 %v1229_v5, %v1214_v31 }
0x1ceb   :  { %v1232_v47 = vpack.c.bf16 %v1231_v46, %v1231_v46 }
0x1ced   :  { %1234 = vrot.lane.b32.xlu1 %v1232_v47, %s1777_s23  ;;  %v1579_v47 = vld [vmem:[%s2218_s7 + $0x10] sm:$0xff] }
0x1cee   :  { %1408 = vmatpush.bf16.msra.mxu2 %v1579_v47 }
0x1d1a   :  { %v856_v49 = vpop.f32.mrf.mxu3 }
0x1d1b   :  { %v857_v62 = vadd.f32 %v2052_v9, %v856_v49 }
0x1d22   :  { %v858_v16 = vpop.f32.mrf.mxu3 }
0x1d23   :  { %v859_v18 = vadd.f32 %v2052_v9, %v858_v16 }
0x1d5f   :  { %v1235_v48 = vpop.permute.xlu1 %1234 }
0x1d60   :  { %1540 = vmatmul.msk.bf16.vlgmr.msrb.gmra.mxu0 %vm259_vm10, %v1235_v48  ;;  %v1577_v48 = vld [vmem:[%s2218_s7] sm:$0xff] }
0x1ddd   :  { %v1248_v11 = vpop.f32.mrf.mxu0 }
0x1dde   :  { %v1252_v50 = vadd.f32 %v1248_v11, %v857_v62 }
0x1de0   :  { %v1253_v52 = vmul.f32 %v1252_v50, %v1914_v25 }
0x1de2   :  { %v1541_v27 = vmul.f32 -1.442695, %v1253_v52 }
0x1de4   :  { %1680 = vpow2.f32 %v1541_v27 }
0x1de5   :  { %v1250_v54 = vpop.f32.mrf.mxu0 }
0x1de6   :  { %v1595_v54 = vld [vmem:[%s2219_s8] ss:$0 sm:$0xff] }
0x1dea   :  { %v1681_v55 = vpop.eup %1680 }
0x1deb   :  { %v1257_v39 = vadd.f32 1.0, %v1681_v55 }
0x1ded   :  { %1682 = vrcp.f32 %v1257_v39  ;;  %v1269_v60 = vand.u32 2147483648, %v1257_v39  ;;  %v1267_v12 = vand.u32 2147483647, %v1257_v39  ;;  %vm1263_vm1 = vweird.f32 %v1257_v39 }
0x1def   :  { %v1270_v1 = vor.u32 1.1754944e-38, %v1269_v60  ;;  %vm1268_vm3 = vcmp.eq.f32.partialorder %v1267_v12, 8.507059e+37 }
0x1df3   :  { %v1683_v56 = vpop.eup %1682 }
0x1df4   :  { %v1259_v57 = vmul.f32 %v1683_v56, %v1257_v39  ;;  %vm1264_vm0 = vweird.f32 %v1683_v56 }
0x1df5   :  { %vm1265_vm2 = vmor %vm1263_vm1, %vm1264_vm0 }
0x1df6   :  { %v1260_v59 = vsub.f32 1.0, %v1259_v57 }
0x1df8   :  { %v1261_v17 = vmul.f32 %v1683_v56, %v1260_v59 }
0x1dfa   :  { %v1262_v61 = vadd.f32 %v1683_v56, %v1261_v17 }
0x1dfc   :  { %v1266_v3 = vsel %vm1265_vm2, %v1683_v56, %v1262_v61 }
0x1dfd   :  { %v1271_v4 = vsel %vm1268_vm3, %v1270_v1, %v1266_v3 }
0x1dfe   :  { %v1273_v15 = vmul.f32 2.0, %v1271_v4 }
0x1e00   :  { %v1542_v58 = vadd.f32 -1.0, %v1273_v15 }
0x1e02   :  { %v1275_v6 = vsel %vm1907_vm5, %v1542_v58, %v1271_v4 }
0x1e03   :  { %1278 = vrot.lane.b32.xlu2 %v1275_v6, %s1770_s17  ;;  %v1276_v51 = vmul.f32 %v1275_v6, %v1225_v38 }
0x1e5d   :  { %v1279_v53 = vpop.permute.xlu2 %1278 }
0x1e5e   :  { %v1281_v7 = vmul.f32 %v1279_v53, %v1275_v6 }
0x1e60   :  { %1283 = vrot.lane.b32.xlu0 %v1281_v7, %s1777_s23 }
0x1ed2   :  { %v1284_v63 = vpop.permute.xlu0 %1283 }
0x1ed3   :  { %v1286_v8 = vadd.f32 %v1284_v63, %v1276_v51 }
0x1ed5   :  { %1684 = vtanh.f32 %v1286_v8 }
0x1edb   :  { %v1685_v0 = vpop.eup %1684 }
0x1edc   :  { %1289 = vrot.lane.b32.xlu1 %v1685_v0, %s1770_s17 }
0x1f4e   :  { %v1290_v10 = vpop.permute.xlu1 %1289 }
0x1f4f   :  { %v1292_v13 = vmul.f32 %v1290_v10, %v1275_v6 }
0x1f51   :  { %v1293_v14 = vpack.c.bf16 %v1292_v13, %v1292_v13 }
0x1f53   :  { %1295 = vrot.lane.b32.xlu2 %v1293_v14, %s1777_s23 }
0x1fad   :  { %v1296_v20 = vpop.permute.xlu2 %1295 }
0x1fae   :  { %1543 = vmatmul.msk.bf16.vlgmr.msra.gmra.mxu1 %vm259_vm10, %v1296_v20 }
0x202b   :  { %v1309_v19 = vpop.f32.mrf.mxu1 }
0x202c   :  { %v1313_v22 = vadd.f32 %v1309_v19, %v859_v18 }
0x202e   :  { %v1314_v23 = vmul.f32 %v1313_v22, %v1914_v25 }
0x2030   :  { %v1544_v24 = vmul.f32 -1.442695, %v1314_v23 }
0x2032   :  { %1686 = vpow2.f32 %v1544_v24 }
0x2033   :  { %v1311_v26 = vpop.f32.mrf.mxu1 }
0x2038   :  { %v1687_v28 = vpop.eup %1686 }
0x2039   :  { %v1318_v29 = vadd.f32 1.0, %v1687_v28 }
0x203b   :  { %1688 = vrcp.f32 %v1318_v29  ;;  %v1330_v33 = vand.u32 2147483648, %v1318_v29  ;;  %v1328_v35 = vand.u32 2147483647, %v1318_v29  ;;  %vm1324_vm6 = vweird.f32 %v1318_v29 }
0x203d   :  { %v1331_v9 = vor.u32 1.1754944e-38, %v1330_v33  ;;  %vm1329_vm8 = vcmp.eq.f32.partialorder %v1328_v35, 8.507059e+37 }
0x2041   :  { %v1689_v30 = vpop.eup %1688 }
0x2042   :  { %v1320_v31 = vmul.f32 %v1689_v30, %v1318_v29  ;;  %vm1325_vm4 = vweird.f32 %v1689_v30 }
0x2043   :  { %vm1326_vm7 = vmor %vm1324_vm6, %vm1325_vm4 }
0x2044   :  { %v1321_v32 = vsub.f32 1.0, %v1320_v31 }
0x2046   :  { %v1322_v34 = vmul.f32 %v1689_v30, %v1321_v32 }
0x2048   :  { %v1323_v2 = vadd.f32 %v1689_v30, %v1322_v34 }
0x204a   :  { %v1327_v37 = vsel %vm1326_vm7, %v1689_v30, %v1323_v2 }
0x204b   :  { %v1332_v25 = vsel %vm1329_vm8, %v1331_v9, %v1327_v37 }
0x204c   :  { %v1334_v38 = vmul.f32 2.0, %v1332_v25 }
0x204e   :  { %v1545_v40 = vadd.f32 -1.0, %v1334_v38 }
0x2050   :  { %v1336_v41 = vsel %vm1907_vm5, %v1545_v40, %v1332_v25  ;;  %vm1399_vm5 = vcmask 523264  }
0x2051   :  { %1339 = vrot.lane.b32.xlu0 %v1336_v41, %s1770_s17  ;;  %v1337_v44 = vmul.f32 %v1336_v41, %v1286_v8 }
0x20c3   :  { %v1340_v42 = vpop.permute.xlu0 %1339 }
0x20c4   :  { %v1342_v43 = vmul.f32 %v1340_v42, %v1336_v41 }
0x20c6   :  { %1344 = vrot.lane.b32.xlu1 %v1342_v43, %s1777_s23 }
0x20ce   :  { %1358 = vrot.lane.b32.xlu1 %v2161_v36, %s1770_s17  ;;  %v1578_v36 = vld [vmem:[%s2218_s7 + $0x8] sm:$0xff] }
0x20cf   :  { %1409 = vmatpush.bf16.msra.mxu2 %v1578_v36 }
0x20d3   :  { %1410 = vmatpush.bf16.msra.mxu2 %v1577_v48 }
0x2138   :  { %v1345_v45 = vpop.permute.xlu1 %1344 }
0x2139   :  { %v1347_v5 = vadd.f32 %v1345_v45, %v1337_v44 }
0x213b   :  { %1690 = vtanh.f32 %v1347_v5 }
0x2140   :  { %v1359_v11 = vpop.permute.xlu1 %1358 }
0x2141   :  { %v1691_v46 = vpop.eup %1690 }
0x2142   :  { %1350 = vrot.lane.b32.xlu2 %v1691_v46, %s1770_s17 }
0x219c   :  { %v1351_v49 = vpop.permute.xlu2 %1350 }
0x219d   :  { %v1353_v62 = vmul.f32 %v1351_v49, %v1336_v41 }
0x219f   :  { %1355 = vrot.lane.b32.xlu0 %v1353_v62, %s1777_s23 }
0x2211   :  { %v1356_v50 = vpop.permute.xlu0 %1355 }
0x2212   :  { %v1361_v52 = vsel %vm259_vm10, %v1356_v50, %v1359_v11 }
0x2213   :  { %v1362_v27 = vpack.c.bf16 %v1361_v52, %v1361_v52 }
0x2215   :  { %1562 = vmatmul.msk.bf16.vlgmr.msra.gmra.mxu2 %vm1399_vm5, %v1362_v27 }
0x2298   :  { %v1412_v55 = vpop.f32.mrf.mxu2 }
0x2299   :  { %v1413_v39 = vadd.f32 %v1595_v54, %v1412_v55 }
0x229b   :  { %v1416_v56 = vmax.f32 %v1413_v39, 0.0 }
0x229d   :  { %1417 = vst [vmem:[%s2220_s9] sm:$0xff] %v1416_v56 }
0x22a0   :  { %v1414_v57 = vpop.f32.mrf.mxu2 }
0x22a1   :  { %1422 = vsyncpa [#allocation4], 1 }
0x22a2   :  { %1423 = vsyncpa [#allocation6], 1 }

</bundles_post_ra>
